<compile_context>
chip_gen: v5e
topology: v5e:2x2
jax: 0.10.0
libtpu: 0.0.40
codegen_flags: <defaults>
</compile_context>

<pallas_src>
import math

import jax
import jax.numpy as jnp
from jax import lax
from jax.experimental import pallas as pl
from jax.experimental.pallas import tpu as pltpu

# ----------------------------- synthetic BERT config -----------------------------
VOCAB = 64
HIDDEN = 32
N_LAYERS = 2
N_HEADS = 2
HEAD_DIM = HIDDEN // N_HEADS
INTERMEDIATE = 64
MAX_POS = 16
NUM_LABELS = 2
LN_EPS = 1e-12
LANE = 128          # lane-dense pad width for the kernel outputs


# ----------------------------- in-kernel helpers -----------------------------
def _layernorm(x, g, b):
    mean = jnp.mean(x, axis=-1, keepdims=True)
    var = jnp.mean((x - mean) * (x - mean), axis=-1, keepdims=True)
    return (x - mean) * lax.rsqrt(var + LN_EPS) * g + b


def _gelu(x):
    # TODO(synk): HF BERT uses exact erf-GELU; tanh approximation used here.
    return 0.5 * x * (1.0 + jnp.tanh(0.7978845608028654 * (x + 0.044715 * x * x * x)))


# ----------------------------- the fused kernel -----------------------------
def _bert_fused_kernel(x_ref, bias_ref, eg_ref, eb_ref,
                       wq_ref, bq_ref, wk_ref, bk_ref, wv_ref, bv_ref,
                       wao_ref, bao_ref, g1_ref, b1_ref,
                       wfi_ref, bfi_ref, wfo_ref, bfo_ref, g2_ref, b2_ref,
                       pw_ref, pb_ref, cw_ref, cb_ref,
                       logits_ref, pooled_ref):
    """Whole BERT forward for the flattened (B*S, H) batch in one grid step.

    All intermediates stay in vregs; the only HBM traffic is the small inputs
    and two lane-dense (B*S, 128) output slabs.
    """
    # Embedding LayerNorm.
    x = _layernorm(x_ref[...].astype(jnp.float32), eg_ref[...], eb_ref[...])
    bias = bias_ref[...]                       # (BS, BS) block-diagonal key mask

    for l in range(N_LAYERS):
        # ---- self-attention: per-head projections, softmax, and per-head
        # ---- output-projection accumulation (no ctx scratch, no lane slices).
        attn = jnp.zeros_like(x)
        for h in range(N_HEADS):
            q = jnp.dot(x, wq_ref[l, h], preferred_element_type=jnp.float32) + bq_ref[l, h]
            k = jnp.dot(x, wk_ref[l, h], preferred_element_type=jnp.float32) + bk_ref[l, h]
            v = jnp.dot(x, wv_ref[l, h], preferred_element_type=jnp.float32) + bv_ref[l, h]
            s = lax.dot_general(q, k, (((1,), (1,)), ((), ())),
                                preferred_element_type=jnp.float32) + bias
            s = s - jnp.max(s, axis=-1, keepdims=True)
            p = jnp.exp(s)
            p = p * pl.reciprocal(jnp.sum(p, axis=-1, keepdims=True), approx=True)
            ctx = jnp.dot(p, v, preferred_element_type=jnp.float32)
            attn = attn + jnp.dot(ctx, wao_ref[l, h], preferred_element_type=jnp.float32)
        attn = attn + bao_ref[l]

        # Residual + LayerNorm.
        x = _layernorm(attn + x, g1_ref[l], b1_ref[l])

        # FFN (GELU) + residual + LayerNorm.
        h_mid = _gelu(jnp.dot(x, wfi_ref[l], preferred_element_type=jnp.float32) + bfi_ref[l])
        ff = jnp.dot(h_mid, wfo_ref[l], preferred_element_type=jnp.float32) + bfo_ref[l]
        x = _layernorm(ff + x, g2_ref[l], b2_ref[l])

    # Pooler (dense + tanh) and classifier, computed for every row into
    # lane-dense 128-wide slabs; the [CLS] rows are selected outside (XLA glue).
    pooled = jnp.tanh(jnp.dot(x, pw_ref[...], preferred_element_type=jnp.float32)
                      + pb_ref[...])
    pooled_ref[...] = pooled.astype(pooled_ref.dtype)
    logits_ref[...] = (jnp.dot(pooled, cw_ref[...], preferred_element_type=jnp.float32)
                       + cb_ref[...]).astype(logits_ref.dtype)


def _fused_call(x2d, bias, pp):
    BS = x2d.shape[0]

    def full(shape):
        return pl.BlockSpec(shape, lambda *_: (0,) * len(shape))

    args = (x2d, bias,
            pp["emb_ln_g"], pp["emb_ln_b"],
            pp["wq"], pp["bq"], pp["wk"], pp["bk"], pp["wv"], pp["bv"],
            pp["wao"], pp["bao"], pp["ln1_g"], pp["ln1_b"],
            pp["wfi"], pp["bfi"], pp["wfo"], pp["bfo"],
            pp["ln2_g"], pp["ln2_b"],
            pp["pw_pad"], pp["pb_pad"], pp["cw_pad"], pp["cb_pad"])

    return pl.pallas_call(
        _bert_fused_kernel,
        out_shape=(jax.ShapeDtypeStruct((BS, LANE), jnp.float32),   # logits (padded)
                   jax.ShapeDtypeStruct((BS, LANE), jnp.float32)),  # pooled (padded)
        grid=(1,),
        in_specs=[full(a.shape) for a in args],
        out_specs=(full((BS, LANE)), full((BS, LANE))),
        compiler_params=pltpu.CompilerParams(
            dimension_semantics=("arbitrary",)),
    )(*args)


# ----------------------------- parameter init / prepare -----------------------------
def init_params(key):
    keys = iter(jax.random.split(key, 128))
    norm = lambda shape: 0.02 * jax.random.normal(next(keys), shape, jnp.float32)
    p = {
        "word_emb": norm((VOCAB, HIDDEN)),
        "pos_emb": norm((MAX_POS, HIDDEN)),
        "type_emb": norm((2, HIDDEN)),
        "emb_ln_g": jnp.ones((HIDDEN,), jnp.float32),
        "emb_ln_b": jnp.zeros((HIDDEN,), jnp.float32),
        "layers": [],
        "pooler_w": norm((HIDDEN, HIDDEN)),
        "pooler_b": jnp.zeros((HIDDEN,), jnp.float32),
        "cls_w": norm((HIDDEN, NUM_LABELS)),
        "cls_b": jnp.zeros((NUM_LABELS,), jnp.float32),
    }
    for _ in range(N_LAYERS):
        p["layers"].append({
            "q_w": norm((HIDDEN, HIDDEN)), "q_b": jnp.zeros((HIDDEN,), jnp.float32),
            "k_w": norm((HIDDEN, HIDDEN)), "k_b": jnp.zeros((HIDDEN,), jnp.float32),
            "v_w": norm((HIDDEN, HIDDEN)), "v_b": jnp.zeros((HIDDEN,), jnp.float32),
            "ao_w": norm((HIDDEN, HIDDEN)), "ao_b": jnp.zeros((HIDDEN,), jnp.float32),
            "attn_ln_g": jnp.ones((HIDDEN,), jnp.float32),
            "attn_ln_b": jnp.zeros((HIDDEN,), jnp.float32),
            "ffn_in_w": norm((HIDDEN, INTERMEDIATE)),
            "ffn_in_b": jnp.zeros((INTERMEDIATE,), jnp.float32),
            "ffn_out_w": norm((INTERMEDIATE, HIDDEN)),
            "ffn_out_b": jnp.zeros((HIDDEN,), jnp.float32),
            "ffn_ln_g": jnp.ones((HIDDEN,), jnp.float32),
            "ffn_ln_b": jnp.zeros((HIDDEN,), jnp.float32),
        })
    return p


def prepare_params(p):
    """One-time repack: per-(layer, head) weight slabs, folded QK scale,
    lane-dense padded pooler/classifier.  Keeps all repacking out of the
    jitted forward (no per-call concatenations / pads)."""
    H, HD, NH, I = HIDDEN, HEAD_DIM, N_HEADS, INTERMEDIATE
    scale = 1.0 / math.sqrt(HD)

    def col_heads(name, sc=1.0):       # (L, NH, H, HD)
        return jnp.stack([
            jnp.stack([lp[name][:, h * HD:(h + 1) * HD] * sc for h in range(NH)])
            for lp in p["layers"]])

    def col_head_bias(name, sc=1.0):   # (L, NH, 1, HD)
        return jnp.stack([
            jnp.stack([lp[name][h * HD:(h + 1) * HD].reshape(1, HD) * sc
                       for h in range(NH)])
            for lp in p["layers"]])

    def stack_vec(name, n):            # (L, 1, n)
        return jnp.stack([lp[name].reshape(1, n) for lp in p["layers"]])

    return {
        "word_emb": p["word_emb"], "pos_emb": p["pos_emb"], "type_emb": p["type_emb"],
        "emb_ln_g": p["emb_ln_g"].reshape(1, H),
        "emb_ln_b": p["emb_ln_b"].reshape(1, H),
        # Q gets the 1/sqrt(head_dim) attention scale folded in.
        "wq": col_heads("q_w", scale), "bq": col_head_bias("q_b", scale),
        "wk": col_heads("k_w"), "bk": col_head_bias("k_b"),
        "wv": col_heads("v_w"), "bv": col_head_bias("v_b"),
        # Output projection split per head along its input (row) dim.
        "wao": jnp.stack([
            jnp.stack([lp["ao_w"][h * HD:(h + 1) * HD, :] for h in range(NH)])
            for lp in p["layers"]]),                              # (L, NH, HD, H)
        "bao": stack_vec("ao_b", H),
        "ln1_g": stack_vec("attn_ln_g", H), "ln1_b": stack_vec("attn_ln_b", H),
        "wfi": jnp.stack([lp["ffn_in_w"] for lp in p["layers"]]),   # (L, H, I)
        "bfi": stack_vec("ffn_in_b", I),
        "wfo": jnp.stack([lp["ffn_out_w"] for lp in p["layers"]]),  # (L, I, H)
        "bfo": stack_vec("ffn_out_b", H),
        "ln2_g": stack_vec("ffn_ln_g", H), "ln2_b": stack_vec("ffn_ln_b", H),
        # Lane-dense (128-wide) pooler / classifier weights.
        "pw_pad": jnp.zeros((H, LANE), jnp.float32).at[:, :H].set(p["pooler_w"]),
        "pb_pad": jnp.zeros((1, LANE), jnp.float32).at[0, :H].set(p["pooler_b"]),
        "cw_pad": jnp.zeros((LANE, LANE), jnp.float32).at[:H, :NUM_LABELS].set(p["cls_w"]),
        "cb_pad": jnp.zeros((1, LANE), jnp.float32).at[0, :NUM_LABELS].set(p["cls_b"]),
    }


# ----------------------------- forward pass -----------------------------
def bert_classifier_forward(pp, input_ids, attention_mask):
    B, S = input_ids.shape
    BS = B * S

    # Embeddings (gathers are XLA glue); token_type_ids default to all-zeros
    # exactly like the reference forward (no token_type_ids passed).
    emb = (jnp.take(pp["word_emb"], input_ids, axis=0)
           + pp["pos_emb"][:S][None, :, :]
           + pp["type_emb"][0][None, None, :])
    x2d = emb.reshape(BS, HIDDEN).astype(jnp.float32)

    # Block-diagonal additive attention bias over the flattened rows:
    # -10000 for padded keys (HF semantics) and for cross-batch keys
    # (exp underflows to exactly 0 -> identical to per-batch attention).
    batch_id = jnp.repeat(jnp.arange(B), S)
    key_valid = attention_mask.reshape(BS) > 0
    ok = (batch_id[:, None] == batch_id[None, :]) & key_valid[None, :]
    bias = jnp.where(ok, 0.0, -10000.0).astype(jnp.float32)

    logits_all, pooled_all = _fused_call(x2d, bias, pp)

    # Select the [CLS] row of each batch element and the real label columns.
    logits = logits_all[::S, :NUM_LABELS]
    pooled = pooled_all[::S, :HIDDEN]
    return logits, pooled


# ----------------------------- main -----------------------------
if __name__ == "__main__":
    key = jax.random.PRNGKey(0)
    pkey, ikey = jax.random.split(key)
    params = prepare_params(init_params(pkey))

    B, S = 2, 8
    input_ids = jax.random.randint(ikey, (B, S), 0, VOCAB, dtype=jnp.int32)
    attention_mask = jnp.array(
        [[1, 1, 1, 1, 1, 1, 1, 1],
         [1, 1, 1, 1, 1, 1, 0, 0]], dtype=jnp.int32)

    fwd = jax.jit(bert_classifier_forward)
    logits, pooled = fwd(params, input_ids, attention_mask)
    jax.block_until_ready((logits, pooled))
    assert logits.shape == (B, NUM_LABELS) and pooled.shape == (B, HIDDEN)
    print("KERNEL_OK")
</pallas_src>

<mosaic_0001>
module attributes {stable_mosaic.version = 11 : i64} {
  func.func @_bert_fused_kernel(%arg0: i32, %arg1: memref<16x32xf32, #tpu.memory_space<vmem>>, %arg2: memref<16x16xf32, #tpu.memory_space<vmem>>, %arg3: memref<1x32xf32, #tpu.memory_space<vmem>>, %arg4: memref<1x32xf32, #tpu.memory_space<vmem>>, %arg5: memref<2x2x32x16xf32, #tpu.memory_space<vmem>>, %arg6: memref<2x2x1x16xf32, #tpu.memory_space<vmem>>, %arg7: memref<2x2x32x16xf32, #tpu.memory_space<vmem>>, %arg8: memref<2x2x1x16xf32, #tpu.memory_space<vmem>>, %arg9: memref<2x2x32x16xf32, #tpu.memory_space<vmem>>, %arg10: memref<2x2x1x16xf32, #tpu.memory_space<vmem>>, %arg11: memref<2x2x16x32xf32, #tpu.memory_space<vmem>>, %arg12: memref<2x1x32xf32, #tpu.memory_space<vmem>>, %arg13: memref<2x1x32xf32, #tpu.memory_space<vmem>>, %arg14: memref<2x1x32xf32, #tpu.memory_space<vmem>>, %arg15: memref<2x32x64xf32, #tpu.memory_space<vmem>>, %arg16: memref<2x1x64xf32, #tpu.memory_space<vmem>>, %arg17: memref<2x64x32xf32, #tpu.memory_space<vmem>>, %arg18: memref<2x1x32xf32, #tpu.memory_space<vmem>>, %arg19: memref<2x1x32xf32, #tpu.memory_space<vmem>>, %arg20: memref<2x1x32xf32, #tpu.memory_space<vmem>>, %arg21: memref<32x128xf32, #tpu.memory_space<vmem>>, %arg22: memref<1x128xf32, #tpu.memory_space<vmem>>, %arg23: memref<128x128xf32, #tpu.memory_space<vmem>>, %arg24: memref<1x128xf32, #tpu.memory_space<vmem>>, %arg25: memref<16x128xf32, #tpu.memory_space<vmem>>, %arg26: memref<16x128xf32, #tpu.memory_space<vmem>>) attributes {dimension_semantics = [#tpu.dimension_semantics<arbitrary>], iteration_bounds = array<i64: 1>, scalar_prefetch = 0 : i64, scratch_operands = 0 : i64, tpu.core_type = #tpu.core_type<tc>, window_params = [{pipeline_mode = #tpu.pipeline_mode<synchronous>, transform_indices = @transform_0, window_bounds = array<i64: 16, 32>}, {pipeline_mode = #tpu.pipeline_mode<synchronous>, transform_indices = @transform_1, window_bounds = array<i64: 16, 16>}, {pipeline_mode = #tpu.pipeline_mode<synchronous>, transform_indices = @transform_2, window_bounds = array<i64: 1, 32>}, {pipeline_mode = #tpu.pipeline_mode<synchronous>, transform_indices = @transform_3, window_bounds = array<i64: 1, 32>}, {pipeline_mode = #tpu.pipeline_mode<synchronous>, transform_indices = @transform_4, window_bounds = array<i64: 2, 2, 32, 16>}, {pipeline_mode = #tpu.pipeline_mode<synchronous>, transform_indices = @transform_5, window_bounds = array<i64: 2, 2, 1, 16>}, {pipeline_mode = #tpu.pipeline_mode<synchronous>, transform_indices = @transform_6, window_bounds = array<i64: 2, 2, 32, 16>}, {pipeline_mode = #tpu.pipeline_mode<synchronous>, transform_indices = @transform_7, window_bounds = array<i64: 2, 2, 1, 16>}, {pipeline_mode = #tpu.pipeline_mode<synchronous>, transform_indices = @transform_8, window_bounds = array<i64: 2, 2, 32, 16>}, {pipeline_mode = #tpu.pipeline_mode<synchronous>, transform_indices = @transform_9, window_bounds = array<i64: 2, 2, 1, 16>}, {pipeline_mode = #tpu.pipeline_mode<synchronous>, transform_indices = @transform_10, window_bounds = array<i64: 2, 2, 16, 32>}, {pipeline_mode = #tpu.pipeline_mode<synchronous>, transform_indices = @transform_11, window_bounds = array<i64: 2, 1, 32>}, {pipeline_mode = #tpu.pipeline_mode<synchronous>, transform_indices = @transform_12, window_bounds = array<i64: 2, 1, 32>}, {pipeline_mode = #tpu.pipeline_mode<synchronous>, transform_indices = @transform_13, window_bounds = array<i64: 2, 1, 32>}, {pipeline_mode = #tpu.pipeline_mode<synchronous>, transform_indices = @transform_14, window_bounds = array<i64: 2, 32, 64>}, {pipeline_mode = #tpu.pipeline_mode<synchronous>, transform_indices = @transform_15, window_bounds = array<i64: 2, 1, 64>}, {pipeline_mode = #tpu.pipeline_mode<synchronous>, transform_indices = @transform_16, window_bounds = array<i64: 2, 64, 32>}, {pipeline_mode = #tpu.pipeline_mode<synchronous>, transform_indices = @transform_17, window_bounds = array<i64: 2, 1, 32>}, {pipeline_mode = #tpu.pipeline_mode<synchronous>, transform_indices = @transform_18, window_bounds = array<i64: 2, 1, 32>}, {pipeline_mode = #tpu.pipeline_mode<synchronous>, transform_indices = @transform_19, window_bounds = array<i64: 2, 1, 32>}, {pipeline_mode = #tpu.pipeline_mode<synchronous>, transform_indices = @transform_20, window_bounds = array<i64: 32, 128>}, {pipeline_mode = #tpu.pipeline_mode<synchronous>, transform_indices = @transform_21, window_bounds = array<i64: 1, 128>}, {pipeline_mode = #tpu.pipeline_mode<synchronous>, transform_indices = @transform_22, window_bounds = array<i64: 128, 128>}, {pipeline_mode = #tpu.pipeline_mode<synchronous>, transform_indices = @transform_23, window_bounds = array<i64: 1, 128>}, {pipeline_mode = #tpu.pipeline_mode<synchronous>, transform_indices = @transform_24, window_bounds = array<i64: 16, 128>}, {pipeline_mode = #tpu.pipeline_mode<synchronous>, transform_indices = @transform_25, window_bounds = array<i64: 16, 128>}]} {
    %c0 = arith.constant 0 : index
    %c0_0 = arith.constant 0 : index
    %0 = vector.load %arg1[%c0, %c0_0] : memref<16x32xf32, #tpu.memory_space<vmem>>, vector<16x32xf32>
    %c0_1 = arith.constant 0 : index
    %c0_2 = arith.constant 0 : index
    %1 = vector.load %arg3[%c0_1, %c0_2] : memref<1x32xf32, #tpu.memory_space<vmem>>, vector<1x32xf32>
    %c0_3 = arith.constant 0 : index
    %c0_4 = arith.constant 0 : index
    %2 = vector.load %arg4[%c0_3, %c0_4] : memref<1x32xf32, #tpu.memory_space<vmem>>, vector<1x32xf32>
    %cst = arith.constant dense<0.000000e+00> : vector<16xf32>
    %3 = vector.multi_reduction <add>, %0, %cst [1] : vector<16x32xf32> to vector<16xf32>
    %4 = vector.shape_cast %3 : vector<16xf32> to vector<16x1xf32>
    %cst_5 = arith.constant 3.200000e+01 : f32
    %5 = vector.broadcast %cst_5 : f32 to vector<16x1xf32>
    %6 = arith.divf %4, %5 : vector<16x1xf32>
    %7 = vector.broadcast %6 : vector<16x1xf32> to vector<16x32xf32>
    %8 = arith.subf %0, %7 : vector<16x32xf32>
    %9 = vector.broadcast %6 : vector<16x1xf32> to vector<16x32xf32>
    %10 = arith.subf %0, %9 : vector<16x32xf32>
    %11 = arith.mulf %8, %10 : vector<16x32xf32>
    %cst_6 = arith.constant dense<0.000000e+00> : vector<16xf32>
    %12 = vector.multi_reduction <add>, %11, %cst_6 [1] : vector<16x32xf32> to vector<16xf32>
    %13 = vector.shape_cast %12 : vector<16xf32> to vector<16x1xf32>
    %cst_7 = arith.constant 3.200000e+01 : f32
    %14 = vector.broadcast %cst_7 : f32 to vector<16x1xf32>
    %15 = arith.divf %13, %14 : vector<16x1xf32>
    %16 = vector.broadcast %6 : vector<16x1xf32> to vector<16x32xf32>
    %17 = arith.subf %0, %16 : vector<16x32xf32>
    %cst_8 = arith.constant 9.99999996E-13 : f32
    %18 = vector.broadcast %cst_8 : f32 to vector<16x1xf32>
    %19 = arith.addf %15, %18 : vector<16x1xf32>
    %20 = math.rsqrt %19 : vector<16x1xf32>
    %21 = vector.broadcast %20 : vector<16x1xf32> to vector<16x32xf32>
    %22 = arith.mulf %17, %21 : vector<16x32xf32>
    %23 = vector.broadcast %1 : vector<1x32xf32> to vector<16x32xf32>
    %24 = arith.mulf %22, %23 : vector<16x32xf32>
    %25 = vector.broadcast %2 : vector<1x32xf32> to vector<16x32xf32>
    %26 = arith.addf %24, %25 : vector<16x32xf32>
    %c0_9 = arith.constant 0 : index
    %c0_10 = arith.constant 0 : index
    %27 = vector.load %arg2[%c0_9, %c0_10] : memref<16x16xf32, #tpu.memory_space<vmem>>, vector<16x16xf32>
    %cst_11 = arith.constant 0.000000e+00 : f32
    %28 = vector.broadcast %cst_11 : f32 to vector<16x32xf32>
    %c0_12 = arith.constant 0 : index
    %c0_13 = arith.constant 0 : index
    %c0_14 = arith.constant 0 : index
    %c0_15 = arith.constant 0 : index
    %29 = vector.load %arg5[%c0_12, %c0_13, %c0_14, %c0_15] : memref<2x2x32x16xf32, #tpu.memory_space<vmem>>, vector<1x1x32x16xf32>
    %30 = vector.shape_cast %29 : vector<1x1x32x16xf32> to vector<32x16xf32>
    %cst_16 = arith.constant dense<0.000000e+00> : vector<16x16xf32>
    %31 = tpu.matmul %26, %30, %cst_16 {dimension_numbers = #tpu.dot_dimension_numbers<[1], [0], [0], [1], [0, 0, 1, 1], [], []>} : vector<16x32xf32>, vector<32x16xf32>, vector<16x16xf32> -> vector<16x16xf32>
    %c0_17 = arith.constant 0 : index
    %c0_18 = arith.constant 0 : index
    %c0_19 = arith.constant 0 : index
    %c0_20 = arith.constant 0 : index
    %32 = vector.load %arg6[%c0_17, %c0_18, %c0_19, %c0_20] : memref<2x2x1x16xf32, #tpu.memory_space<vmem>>, vector<1x1x1x16xf32>
    %33 = vector.shape_cast %32 : vector<1x1x1x16xf32> to vector<1x16xf32>
    %34 = vector.broadcast %33 : vector<1x16xf32> to vector<16x16xf32>
    %35 = arith.addf %31, %34 : vector<16x16xf32>
    %c0_21 = arith.constant 0 : index
    %c0_22 = arith.constant 0 : index
    %c0_23 = arith.constant 0 : index
    %c0_24 = arith.constant 0 : index
    %36 = vector.load %arg7[%c0_21, %c0_22, %c0_23, %c0_24] : memref<2x2x32x16xf32, #tpu.memory_space<vmem>>, vector<1x1x32x16xf32>
    %37 = vector.shape_cast %36 : vector<1x1x32x16xf32> to vector<32x16xf32>
    %cst_25 = arith.constant dense<0.000000e+00> : vector<16x16xf32>
    %38 = tpu.matmul %26, %37, %cst_25 {dimension_numbers = #tpu.dot_dimension_numbers<[1], [0], [0], [1], [0, 0, 1, 1], [], []>} : vector<16x32xf32>, vector<32x16xf32>, vector<16x16xf32> -> vector<16x16xf32>
    %c0_26 = arith.constant 0 : index
    %c0_27 = arith.constant 0 : index
    %c0_28 = arith.constant 0 : index
    %c0_29 = arith.constant 0 : index
    %39 = vector.load %arg8[%c0_26, %c0_27, %c0_28, %c0_29] : memref<2x2x1x16xf32, #tpu.memory_space<vmem>>, vector<1x1x1x16xf32>
    %40 = vector.shape_cast %39 : vector<1x1x1x16xf32> to vector<1x16xf32>
    %41 = vector.broadcast %40 : vector<1x16xf32> to vector<16x16xf32>
    %42 = arith.addf %38, %41 : vector<16x16xf32>
    %c0_30 = arith.constant 0 : index
    %c0_31 = arith.constant 0 : index
    %c0_32 = arith.constant 0 : index
    %c0_33 = arith.constant 0 : index
    %43 = vector.load %arg9[%c0_30, %c0_31, %c0_32, %c0_33] : memref<2x2x32x16xf32, #tpu.memory_space<vmem>>, vector<1x1x32x16xf32>
    %44 = vector.shape_cast %43 : vector<1x1x32x16xf32> to vector<32x16xf32>
    %cst_34 = arith.constant dense<0.000000e+00> : vector<16x16xf32>
    %45 = tpu.matmul %26, %44, %cst_34 {dimension_numbers = #tpu.dot_dimension_numbers<[1], [0], [0], [1], [0, 0, 1, 1], [], []>} : vector<16x32xf32>, vector<32x16xf32>, vector<16x16xf32> -> vector<16x16xf32>
    %c0_35 = arith.constant 0 : index
    %c0_36 = arith.constant 0 : index
    %c0_37 = arith.constant 0 : index
    %c0_38 = arith.constant 0 : index
    %46 = vector.load %arg10[%c0_35, %c0_36, %c0_37, %c0_38] : memref<2x2x1x16xf32, #tpu.memory_space<vmem>>, vector<1x1x1x16xf32>
    %47 = vector.shape_cast %46 : vector<1x1x1x16xf32> to vector<1x16xf32>
    %48 = vector.broadcast %47 : vector<1x16xf32> to vector<16x16xf32>
    %49 = arith.addf %45, %48 : vector<16x16xf32>
    %cst_39 = arith.constant dense<0.000000e+00> : vector<16x16xf32>
    %50 = tpu.matmul %35, %42, %cst_39 {dimension_numbers = #tpu.dot_dimension_numbers<[1], [1], [0], [0], [0, 0, 1, 0], [], []>} : vector<16x16xf32>, vector<16x16xf32>, vector<16x16xf32> -> vector<16x16xf32>
    %51 = arith.addf %50, %27 : vector<16x16xf32>
    %cst_40 = arith.constant dense<0xFF800000> : vector<16xf32>
    %52 = vector.multi_reduction <maximumf>, %51, %cst_40 [1] : vector<16x16xf32> to vector<16xf32>
    %53 = vector.shape_cast %52 : vector<16xf32> to vector<16x1xf32>
    %54 = vector.broadcast %53 : vector<16x1xf32> to vector<16x16xf32>
    %55 = arith.subf %51, %54 : vector<16x16xf32>
    %56 = math.exp %55 : vector<16x16xf32>
    %cst_41 = arith.constant dense<0.000000e+00> : vector<16xf32>
    %57 = vector.multi_reduction <add>, %56, %cst_41 [1] : vector<16x16xf32> to vector<16xf32>
    %58 = vector.shape_cast %57 : vector<16xf32> to vector<16x1xf32>
    %59 = tpu.reciprocal %58 {approx = true} : vector<16x1xf32> -> vector<16x1xf32>
    %60 = vector.broadcast %59 : vector<16x1xf32> to vector<16x16xf32>
    %61 = arith.mulf %56, %60 : vector<16x16xf32>
    %cst_42 = arith.constant dense<0.000000e+00> : vector<16x16xf32>
    %62 = tpu.matmul %61, %49, %cst_42 {dimension_numbers = #tpu.dot_dimension_numbers<[1], [0], [0], [1], [0, 0, 1, 1], [], []>} : vector<16x16xf32>, vector<16x16xf32>, vector<16x16xf32> -> vector<16x16xf32>
    %c0_43 = arith.constant 0 : index
    %c0_44 = arith.constant 0 : index
    %c0_45 = arith.constant 0 : index
    %c0_46 = arith.constant 0 : index
    %63 = vector.load %arg11[%c0_43, %c0_44, %c0_45, %c0_46] : memref<2x2x16x32xf32, #tpu.memory_space<vmem>>, vector<1x1x16x32xf32>
    %64 = vector.shape_cast %63 : vector<1x1x16x32xf32> to vector<16x32xf32>
    %cst_47 = arith.constant dense<0.000000e+00> : vector<16x32xf32>
    %65 = tpu.matmul %62, %64, %cst_47 {dimension_numbers = #tpu.dot_dimension_numbers<[1], [0], [0], [1], [0, 0, 1, 1], [], []>} : vector<16x16xf32>, vector<16x32xf32>, vector<16x32xf32> -> vector<16x32xf32>
    %66 = arith.addf %28, %65 : vector<16x32xf32>
    %c0_48 = arith.constant 0 : index
    %c1 = arith.constant 1 : index
    %c0_49 = arith.constant 0 : index
    %c0_50 = arith.constant 0 : index
    %67 = vector.load %arg5[%c0_48, %c1, %c0_49, %c0_50] : memref<2x2x32x16xf32, #tpu.memory_space<vmem>>, vector<1x1x32x16xf32>
    %68 = vector.shape_cast %67 : vector<1x1x32x16xf32> to vector<32x16xf32>
    %cst_51 = arith.constant dense<0.000000e+00> : vector<16x16xf32>
    %69 = tpu.matmul %26, %68, %cst_51 {dimension_numbers = #tpu.dot_dimension_numbers<[1], [0], [0], [1], [0, 0, 1, 1], [], []>} : vector<16x32xf32>, vector<32x16xf32>, vector<16x16xf32> -> vector<16x16xf32>
    %c0_52 = arith.constant 0 : index
    %c1_53 = arith.constant 1 : index
    %c0_54 = arith.constant 0 : index
    %c0_55 = arith.constant 0 : index
    %70 = vector.load %arg6[%c0_52, %c1_53, %c0_54, %c0_55] : memref<2x2x1x16xf32, #tpu.memory_space<vmem>>, vector<1x1x1x16xf32>
    %71 = vector.shape_cast %70 : vector<1x1x1x16xf32> to vector<1x16xf32>
    %72 = vector.broadcast %71 : vector<1x16xf32> to vector<16x16xf32>
    %73 = arith.addf %69, %72 : vector<16x16xf32>
    %c0_56 = arith.constant 0 : index
    %c1_57 = arith.constant 1 : index
    %c0_58 = arith.constant 0 : index
    %c0_59 = arith.constant 0 : index
    %74 = vector.load %arg7[%c0_56, %c1_57, %c0_58, %c0_59] : memref<2x2x32x16xf32, #tpu.memory_space<vmem>>, vector<1x1x32x16xf32>
    %75 = vector.shape_cast %74 : vector<1x1x32x16xf32> to vector<32x16xf32>
    %cst_60 = arith.constant dense<0.000000e+00> : vector<16x16xf32>
    %76 = tpu.matmul %26, %75, %cst_60 {dimension_numbers = #tpu.dot_dimension_numbers<[1], [0], [0], [1], [0, 0, 1, 1], [], []>} : vector<16x32xf32>, vector<32x16xf32>, vector<16x16xf32> -> vector<16x16xf32>
    %c0_61 = arith.constant 0 : index
    %c1_62 = arith.constant 1 : index
    %c0_63 = arith.constant 0 : index
    %c0_64 = arith.constant 0 : index
    %77 = vector.load %arg8[%c0_61, %c1_62, %c0_63, %c0_64] : memref<2x2x1x16xf32, #tpu.memory_space<vmem>>, vector<1x1x1x16xf32>
    %78 = vector.shape_cast %77 : vector<1x1x1x16xf32> to vector<1x16xf32>
    %79 = vector.broadcast %78 : vector<1x16xf32> to vector<16x16xf32>
    %80 = arith.addf %76, %79 : vector<16x16xf32>
    %c0_65 = arith.constant 0 : index
    %c1_66 = arith.constant 1 : index
    %c0_67 = arith.constant 0 : index
    %c0_68 = arith.constant 0 : index
    %81 = vector.load %arg9[%c0_65, %c1_66, %c0_67, %c0_68] : memref<2x2x32x16xf32, #tpu.memory_space<vmem>>, vector<1x1x32x16xf32>
    %82 = vector.shape_cast %81 : vector<1x1x32x16xf32> to vector<32x16xf32>
    %cst_69 = arith.constant dense<0.000000e+00> : vector<16x16xf32>
    %83 = tpu.matmul %26, %82, %cst_69 {dimension_numbers = #tpu.dot_dimension_numbers<[1], [0], [0], [1], [0, 0, 1, 1], [], []>} : vector<16x32xf32>, vector<32x16xf32>, vector<16x16xf32> -> vector<16x16xf32>
    %c0_70 = arith.constant 0 : index
    %c1_71 = arith.constant 1 : index
    %c0_72 = arith.constant 0 : index
    %c0_73 = arith.constant 0 : index
    %84 = vector.load %arg10[%c0_70, %c1_71, %c0_72, %c0_73] : memref<2x2x1x16xf32, #tpu.memory_space<vmem>>, vector<1x1x1x16xf32>
    %85 = vector.shape_cast %84 : vector<1x1x1x16xf32> to vector<1x16xf32>
    %86 = vector.broadcast %85 : vector<1x16xf32> to vector<16x16xf32>
    %87 = arith.addf %83, %86 : vector<16x16xf32>
    %cst_74 = arith.constant dense<0.000000e+00> : vector<16x16xf32>
    %88 = tpu.matmul %73, %80, %cst_74 {dimension_numbers = #tpu.dot_dimension_numbers<[1], [1], [0], [0], [0, 0, 1, 0], [], []>} : vector<16x16xf32>, vector<16x16xf32>, vector<16x16xf32> -> vector<16x16xf32>
    %89 = arith.addf %88, %27 : vector<16x16xf32>
    %cst_75 = arith.constant dense<0xFF800000> : vector<16xf32>
    %90 = vector.multi_reduction <maximumf>, %89, %cst_75 [1] : vector<16x16xf32> to vector<16xf32>
    %91 = vector.shape_cast %90 : vector<16xf32> to vector<16x1xf32>
    %92 = vector.broadcast %91 : vector<16x1xf32> to vector<16x16xf32>
    %93 = arith.subf %89, %92 : vector<16x16xf32>
    %94 = math.exp %93 : vector<16x16xf32>
    %cst_76 = arith.constant dense<0.000000e+00> : vector<16xf32>
    %95 = vector.multi_reduction <add>, %94, %cst_76 [1] : vector<16x16xf32> to vector<16xf32>
    %96 = vector.shape_cast %95 : vector<16xf32> to vector<16x1xf32>
    %97 = tpu.reciprocal %96 {approx = true} : vector<16x1xf32> -> vector<16x1xf32>
    %98 = vector.broadcast %97 : vector<16x1xf32> to vector<16x16xf32>
    %99 = arith.mulf %94, %98 : vector<16x16xf32>
    %cst_77 = arith.constant dense<0.000000e+00> : vector<16x16xf32>
    %100 = tpu.matmul %99, %87, %cst_77 {dimension_numbers = #tpu.dot_dimension_numbers<[1], [0], [0], [1], [0, 0, 1, 1], [], []>} : vector<16x16xf32>, vector<16x16xf32>, vector<16x16xf32> -> vector<16x16xf32>
    %c0_78 = arith.constant 0 : index
    %c1_79 = arith.constant 1 : index
    %c0_80 = arith.constant 0 : index
    %c0_81 = arith.constant 0 : index
    %101 = vector.load %arg11[%c0_78, %c1_79, %c0_80, %c0_81] : memref<2x2x16x32xf32, #tpu.memory_space<vmem>>, vector<1x1x16x32xf32>
    %102 = vector.shape_cast %101 : vector<1x1x16x32xf32> to vector<16x32xf32>
    %cst_82 = arith.constant dense<0.000000e+00> : vector<16x32xf32>
    %103 = tpu.matmul %100, %102, %cst_82 {dimension_numbers = #tpu.dot_dimension_numbers<[1], [0], [0], [1], [0, 0, 1, 1], [], []>} : vector<16x16xf32>, vector<16x32xf32>, vector<16x32xf32> -> vector<16x32xf32>
    %104 = arith.addf %66, %103 : vector<16x32xf32>
    %c0_83 = arith.constant 0 : index
    %c0_84 = arith.constant 0 : index
    %c0_85 = arith.constant 0 : index
    %105 = vector.load %arg12[%c0_83, %c0_84, %c0_85] : memref<2x1x32xf32, #tpu.memory_space<vmem>>, vector<1x1x32xf32>
    %106 = vector.shape_cast %105 : vector<1x1x32xf32> to vector<1x32xf32>
    %107 = vector.broadcast %106 : vector<1x32xf32> to vector<16x32xf32>
    %108 = arith.addf %104, %107 : vector<16x32xf32>
    %109 = arith.addf %108, %26 : vector<16x32xf32>
    %c0_86 = arith.constant 0 : index
    %c0_87 = arith.constant 0 : index
    %c0_88 = arith.constant 0 : index
    %110 = vector.load %arg13[%c0_86, %c0_87, %c0_88] : memref<2x1x32xf32, #tpu.memory_space<vmem>>, vector<1x1x32xf32>
    %111 = vector.shape_cast %110 : vector<1x1x32xf32> to vector<1x32xf32>
    %c0_89 = arith.constant 0 : index
    %c0_90 = arith.constant 0 : index
    %c0_91 = arith.constant 0 : index
    %112 = vector.load %arg14[%c0_89, %c0_90, %c0_91] : memref<2x1x32xf32, #tpu.memory_space<vmem>>, vector<1x1x32xf32>
    %113 = vector.shape_cast %112 : vector<1x1x32xf32> to vector<1x32xf32>
    %cst_92 = arith.constant dense<0.000000e+00> : vector<16xf32>
    %114 = vector.multi_reduction <add>, %109, %cst_92 [1] : vector<16x32xf32> to vector<16xf32>
    %115 = vector.shape_cast %114 : vector<16xf32> to vector<16x1xf32>
    %cst_93 = arith.constant 3.200000e+01 : f32
    %116 = vector.broadcast %cst_93 : f32 to vector<16x1xf32>
    %117 = arith.divf %115, %116 : vector<16x1xf32>
    %118 = vector.broadcast %117 : vector<16x1xf32> to vector<16x32xf32>
    %119 = arith.subf %109, %118 : vector<16x32xf32>
    %120 = vector.broadcast %117 : vector<16x1xf32> to vector<16x32xf32>
    %121 = arith.subf %109, %120 : vector<16x32xf32>
    %122 = arith.mulf %119, %121 : vector<16x32xf32>
    %cst_94 = arith.constant dense<0.000000e+00> : vector<16xf32>
    %123 = vector.multi_reduction <add>, %122, %cst_94 [1] : vector<16x32xf32> to vector<16xf32>
    %124 = vector.shape_cast %123 : vector<16xf32> to vector<16x1xf32>
    %cst_95 = arith.constant 3.200000e+01 : f32
    %125 = vector.broadcast %cst_95 : f32 to vector<16x1xf32>
    %126 = arith.divf %124, %125 : vector<16x1xf32>
    %127 = vector.broadcast %117 : vector<16x1xf32> to vector<16x32xf32>
    %128 = arith.subf %109, %127 : vector<16x32xf32>
    %cst_96 = arith.constant 9.99999996E-13 : f32
    %129 = vector.broadcast %cst_96 : f32 to vector<16x1xf32>
    %130 = arith.addf %126, %129 : vector<16x1xf32>
    %131 = math.rsqrt %130 : vector<16x1xf32>
    %132 = vector.broadcast %131 : vector<16x1xf32> to vector<16x32xf32>
    %133 = arith.mulf %128, %132 : vector<16x32xf32>
    %134 = vector.broadcast %111 : vector<1x32xf32> to vector<16x32xf32>
    %135 = arith.mulf %133, %134 : vector<16x32xf32>
    %136 = vector.broadcast %113 : vector<1x32xf32> to vector<16x32xf32>
    %137 = arith.addf %135, %136 : vector<16x32xf32>
    %c0_97 = arith.constant 0 : index
    %c0_98 = arith.constant 0 : index
    %c0_99 = arith.constant 0 : index
    %138 = vector.load %arg15[%c0_97, %c0_98, %c0_99] : memref<2x32x64xf32, #tpu.memory_space<vmem>>, vector<1x32x64xf32>
    %139 = vector.shape_cast %138 : vector<1x32x64xf32> to vector<32x64xf32>
    %cst_100 = arith.constant dense<0.000000e+00> : vector<16x64xf32>
    %140 = tpu.matmul %137, %139, %cst_100 {dimension_numbers = #tpu.dot_dimension_numbers<[1], [0], [0], [1], [0, 0, 1, 1], [], []>} : vector<16x32xf32>, vector<32x64xf32>, vector<16x64xf32> -> vector<16x64xf32>
    %c0_101 = arith.constant 0 : index
    %c0_102 = arith.constant 0 : index
    %c0_103 = arith.constant 0 : index
    %141 = vector.load %arg16[%c0_101, %c0_102, %c0_103] : memref<2x1x64xf32, #tpu.memory_space<vmem>>, vector<1x1x64xf32>
    %142 = vector.shape_cast %141 : vector<1x1x64xf32> to vector<1x64xf32>
    %143 = vector.broadcast %142 : vector<1x64xf32> to vector<16x64xf32>
    %144 = arith.addf %140, %143 : vector<16x64xf32>
    %cst_104 = arith.constant 5.000000e-01 : f32
    %145 = vector.broadcast %cst_104 : f32 to vector<16x64xf32>
    %146 = arith.mulf %145, %144 : vector<16x64xf32>
    %cst_105 = arith.constant 4.471500e-02 : f32
    %147 = vector.broadcast %cst_105 : f32 to vector<16x64xf32>
    %148 = arith.mulf %147, %144 : vector<16x64xf32>
    %149 = arith.mulf %148, %144 : vector<16x64xf32>
    %150 = arith.mulf %149, %144 : vector<16x64xf32>
    %151 = arith.addf %144, %150 : vector<16x64xf32>
    %cst_106 = arith.constant 0.797884583 : f32
    %152 = vector.broadcast %cst_106 : f32 to vector<16x64xf32>
    %153 = arith.mulf %152, %151 : vector<16x64xf32>
    %154 = math.tanh %153 : vector<16x64xf32>
    %cst_107 = arith.constant 1.000000e+00 : f32
    %155 = vector.broadcast %cst_107 : f32 to vector<16x64xf32>
    %156 = arith.addf %155, %154 : vector<16x64xf32>
    %157 = arith.mulf %146, %156 : vector<16x64xf32>
    %c0_108 = arith.constant 0 : index
    %c0_109 = arith.constant 0 : index
    %c0_110 = arith.constant 0 : index
    %158 = vector.load %arg17[%c0_108, %c0_109, %c0_110] : memref<2x64x32xf32, #tpu.memory_space<vmem>>, vector<1x64x32xf32>
    %159 = vector.shape_cast %158 : vector<1x64x32xf32> to vector<64x32xf32>
    %cst_111 = arith.constant dense<0.000000e+00> : vector<16x32xf32>
    %160 = tpu.matmul %157, %159, %cst_111 {dimension_numbers = #tpu.dot_dimension_numbers<[1], [0], [0], [1], [0, 0, 1, 1], [], []>} : vector<16x64xf32>, vector<64x32xf32>, vector<16x32xf32> -> vector<16x32xf32>
    %c0_112 = arith.constant 0 : index
    %c0_113 = arith.constant 0 : index
    %c0_114 = arith.constant 0 : index
    %161 = vector.load %arg18[%c0_112, %c0_113, %c0_114] : memref<2x1x32xf32, #tpu.memory_space<vmem>>, vector<1x1x32xf32>
    %162 = vector.shape_cast %161 : vector<1x1x32xf32> to vector<1x32xf32>
    %163 = vector.broadcast %162 : vector<1x32xf32> to vector<16x32xf32>
    %164 = arith.addf %160, %163 : vector<16x32xf32>
    %165 = arith.addf %164, %137 : vector<16x32xf32>
    %c0_115 = arith.constant 0 : index
    %c0_116 = arith.constant 0 : index
    %c0_117 = arith.constant 0 : index
    %166 = vector.load %arg19[%c0_115, %c0_116, %c0_117] : memref<2x1x32xf32, #tpu.memory_space<vmem>>, vector<1x1x32xf32>
    %167 = vector.shape_cast %166 : vector<1x1x32xf32> to vector<1x32xf32>
    %c0_118 = arith.constant 0 : index
    %c0_119 = arith.constant 0 : index
    %c0_120 = arith.constant 0 : index
    %168 = vector.load %arg20[%c0_118, %c0_119, %c0_120] : memref<2x1x32xf32, #tpu.memory_space<vmem>>, vector<1x1x32xf32>
    %169 = vector.shape_cast %168 : vector<1x1x32xf32> to vector<1x32xf32>
    %cst_121 = arith.constant dense<0.000000e+00> : vector<16xf32>
    %170 = vector.multi_reduction <add>, %165, %cst_121 [1] : vector<16x32xf32> to vector<16xf32>
    %171 = vector.shape_cast %170 : vector<16xf32> to vector<16x1xf32>
    %cst_122 = arith.constant 3.200000e+01 : f32
    %172 = vector.broadcast %cst_122 : f32 to vector<16x1xf32>
    %173 = arith.divf %171, %172 : vector<16x1xf32>
    %174 = vector.broadcast %173 : vector<16x1xf32> to vector<16x32xf32>
    %175 = arith.subf %165, %174 : vector<16x32xf32>
    %176 = vector.broadcast %173 : vector<16x1xf32> to vector<16x32xf32>
    %177 = arith.subf %165, %176 : vector<16x32xf32>
    %178 = arith.mulf %175, %177 : vector<16x32xf32>
    %cst_123 = arith.constant dense<0.000000e+00> : vector<16xf32>
    %179 = vector.multi_reduction <add>, %178, %cst_123 [1] : vector<16x32xf32> to vector<16xf32>
    %180 = vector.shape_cast %179 : vector<16xf32> to vector<16x1xf32>
    %cst_124 = arith.constant 3.200000e+01 : f32
    %181 = vector.broadcast %cst_124 : f32 to vector<16x1xf32>
    %182 = arith.divf %180, %181 : vector<16x1xf32>
    %183 = vector.broadcast %173 : vector<16x1xf32> to vector<16x32xf32>
    %184 = arith.subf %165, %183 : vector<16x32xf32>
    %cst_125 = arith.constant 9.99999996E-13 : f32
    %185 = vector.broadcast %cst_125 : f32 to vector<16x1xf32>
    %186 = arith.addf %182, %185 : vector<16x1xf32>
    %187 = math.rsqrt %186 : vector<16x1xf32>
    %188 = vector.broadcast %187 : vector<16x1xf32> to vector<16x32xf32>
    %189 = arith.mulf %184, %188 : vector<16x32xf32>
    %190 = vector.broadcast %167 : vector<1x32xf32> to vector<16x32xf32>
    %191 = arith.mulf %189, %190 : vector<16x32xf32>
    %192 = vector.broadcast %169 : vector<1x32xf32> to vector<16x32xf32>
    %193 = arith.addf %191, %192 : vector<16x32xf32>
    %cst_126 = arith.constant 0.000000e+00 : f32
    %194 = vector.broadcast %cst_126 : f32 to vector<16x32xf32>
    %c1_127 = arith.constant 1 : index
    %c0_128 = arith.constant 0 : index
    %c0_129 = arith.constant 0 : index
    %c0_130 = arith.constant 0 : index
    %195 = vector.load %arg5[%c1_127, %c0_128, %c0_129, %c0_130] : memref<2x2x32x16xf32, #tpu.memory_space<vmem>>, vector<1x1x32x16xf32>
    %196 = vector.shape_cast %195 : vector<1x1x32x16xf32> to vector<32x16xf32>
    %cst_131 = arith.constant dense<0.000000e+00> : vector<16x16xf32>
    %197 = tpu.matmul %193, %196, %cst_131 {dimension_numbers = #tpu.dot_dimension_numbers<[1], [0], [0], [1], [0, 0, 1, 1], [], []>} : vector<16x32xf32>, vector<32x16xf32>, vector<16x16xf32> -> vector<16x16xf32>
    %c1_132 = arith.constant 1 : index
    %c0_133 = arith.constant 0 : index
    %c0_134 = arith.constant 0 : index
    %c0_135 = arith.constant 0 : index
    %198 = vector.load %arg6[%c1_132, %c0_133, %c0_134, %c0_135] : memref<2x2x1x16xf32, #tpu.memory_space<vmem>>, vector<1x1x1x16xf32>
    %199 = vector.shape_cast %198 : vector<1x1x1x16xf32> to vector<1x16xf32>
    %200 = vector.broadcast %199 : vector<1x16xf32> to vector<16x16xf32>
    %201 = arith.addf %197, %200 : vector<16x16xf32>
    %c1_136 = arith.constant 1 : index
    %c0_137 = arith.constant 0 : index
    %c0_138 = arith.constant 0 : index
    %c0_139 = arith.constant 0 : index
    %202 = vector.load %arg7[%c1_136, %c0_137, %c0_138, %c0_139] : memref<2x2x32x16xf32, #tpu.memory_space<vmem>>, vector<1x1x32x16xf32>
    %203 = vector.shape_cast %202 : vector<1x1x32x16xf32> to vector<32x16xf32>
    %cst_140 = arith.constant dense<0.000000e+00> : vector<16x16xf32>
    %204 = tpu.matmul %193, %203, %cst_140 {dimension_numbers = #tpu.dot_dimension_numbers<[1], [0], [0], [1], [0, 0, 1, 1], [], []>} : vector<16x32xf32>, vector<32x16xf32>, vector<16x16xf32> -> vector<16x16xf32>
    %c1_141 = arith.constant 1 : index
    %c0_142 = arith.constant 0 : index
    %c0_143 = arith.constant 0 : index
    %c0_144 = arith.constant 0 : index
    %205 = vector.load %arg8[%c1_141, %c0_142, %c0_143, %c0_144] : memref<2x2x1x16xf32, #tpu.memory_space<vmem>>, vector<1x1x1x16xf32>
    %206 = vector.shape_cast %205 : vector<1x1x1x16xf32> to vector<1x16xf32>
    %207 = vector.broadcast %206 : vector<1x16xf32> to vector<16x16xf32>
    %208 = arith.addf %204, %207 : vector<16x16xf32>
    %c1_145 = arith.constant 1 : index
    %c0_146 = arith.constant 0 : index
    %c0_147 = arith.constant 0 : index
    %c0_148 = arith.constant 0 : index
    %209 = vector.load %arg9[%c1_145, %c0_146, %c0_147, %c0_148] : memref<2x2x32x16xf32, #tpu.memory_space<vmem>>, vector<1x1x32x16xf32>
    %210 = vector.shape_cast %209 : vector<1x1x32x16xf32> to vector<32x16xf32>
    %cst_149 = arith.constant dense<0.000000e+00> : vector<16x16xf32>
    %211 = tpu.matmul %193, %210, %cst_149 {dimension_numbers = #tpu.dot_dimension_numbers<[1], [0], [0], [1], [0, 0, 1, 1], [], []>} : vector<16x32xf32>, vector<32x16xf32>, vector<16x16xf32> -> vector<16x16xf32>
    %c1_150 = arith.constant 1 : index
    %c0_151 = arith.constant 0 : index
    %c0_152 = arith.constant 0 : index
    %c0_153 = arith.constant 0 : index
    %212 = vector.load %arg10[%c1_150, %c0_151, %c0_152, %c0_153] : memref<2x2x1x16xf32, #tpu.memory_space<vmem>>, vector<1x1x1x16xf32>
    %213 = vector.shape_cast %212 : vector<1x1x1x16xf32> to vector<1x16xf32>
    %214 = vector.broadcast %213 : vector<1x16xf32> to vector<16x16xf32>
    %215 = arith.addf %211, %214 : vector<16x16xf32>
    %cst_154 = arith.constant dense<0.000000e+00> : vector<16x16xf32>
    %216 = tpu.matmul %201, %208, %cst_154 {dimension_numbers = #tpu.dot_dimension_numbers<[1], [1], [0], [0], [0, 0, 1, 0], [], []>} : vector<16x16xf32>, vector<16x16xf32>, vector<16x16xf32> -> vector<16x16xf32>
    %217 = arith.addf %216, %27 : vector<16x16xf32>
    %cst_155 = arith.constant dense<0xFF800000> : vector<16xf32>
    %218 = vector.multi_reduction <maximumf>, %217, %cst_155 [1] : vector<16x16xf32> to vector<16xf32>
    %219 = vector.shape_cast %218 : vector<16xf32> to vector<16x1xf32>
    %220 = vector.broadcast %219 : vector<16x1xf32> to vector<16x16xf32>
    %221 = arith.subf %217, %220 : vector<16x16xf32>
    %222 = math.exp %221 : vector<16x16xf32>
    %cst_156 = arith.constant dense<0.000000e+00> : vector<16xf32>
    %223 = vector.multi_reduction <add>, %222, %cst_156 [1] : vector<16x16xf32> to vector<16xf32>
    %224 = vector.shape_cast %223 : vector<16xf32> to vector<16x1xf32>
    %225 = tpu.reciprocal %224 {approx = true} : vector<16x1xf32> -> vector<16x1xf32>
    %226 = vector.broadcast %225 : vector<16x1xf32> to vector<16x16xf32>
    %227 = arith.mulf %222, %226 : vector<16x16xf32>
    %cst_157 = arith.constant dense<0.000000e+00> : vector<16x16xf32>
    %228 = tpu.matmul %227, %215, %cst_157 {dimension_numbers = #tpu.dot_dimension_numbers<[1], [0], [0], [1], [0, 0, 1, 1], [], []>} : vector<16x16xf32>, vector<16x16xf32>, vector<16x16xf32> -> vector<16x16xf32>
    %c1_158 = arith.constant 1 : index
    %c0_159 = arith.constant 0 : index
    %c0_160 = arith.constant 0 : index
    %c0_161 = arith.constant 0 : index
    %229 = vector.load %arg11[%c1_158, %c0_159, %c0_160, %c0_161] : memref<2x2x16x32xf32, #tpu.memory_space<vmem>>, vector<1x1x16x32xf32>
    %230 = vector.shape_cast %229 : vector<1x1x16x32xf32> to vector<16x32xf32>
    %cst_162 = arith.constant dense<0.000000e+00> : vector<16x32xf32>
    %231 = tpu.matmul %228, %230, %cst_162 {dimension_numbers = #tpu.dot_dimension_numbers<[1], [0], [0], [1], [0, 0, 1, 1], [], []>} : vector<16x16xf32>, vector<16x32xf32>, vector<16x32xf32> -> vector<16x32xf32>
    %232 = arith.addf %194, %231 : vector<16x32xf32>
    %c1_163 = arith.constant 1 : index
    %c1_164 = arith.constant 1 : index
    %c0_165 = arith.constant 0 : index
    %c0_166 = arith.constant 0 : index
    %233 = vector.load %arg5[%c1_163, %c1_164, %c0_165, %c0_166] : memref<2x2x32x16xf32, #tpu.memory_space<vmem>>, vector<1x1x32x16xf32>
    %234 = vector.shape_cast %233 : vector<1x1x32x16xf32> to vector<32x16xf32>
    %cst_167 = arith.constant dense<0.000000e+00> : vector<16x16xf32>
    %235 = tpu.matmul %193, %234, %cst_167 {dimension_numbers = #tpu.dot_dimension_numbers<[1], [0], [0], [1], [0, 0, 1, 1], [], []>} : vector<16x32xf32>, vector<32x16xf32>, vector<16x16xf32> -> vector<16x16xf32>
    %c1_168 = arith.constant 1 : index
    %c1_169 = arith.constant 1 : index
    %c0_170 = arith.constant 0 : index
    %c0_171 = arith.constant 0 : index
    %236 = vector.load %arg6[%c1_168, %c1_169, %c0_170, %c0_171] : memref<2x2x1x16xf32, #tpu.memory_space<vmem>>, vector<1x1x1x16xf32>
    %237 = vector.shape_cast %236 : vector<1x1x1x16xf32> to vector<1x16xf32>
    %238 = vector.broadcast %237 : vector<1x16xf32> to vector<16x16xf32>
    %239 = arith.addf %235, %238 : vector<16x16xf32>
    %c1_172 = arith.constant 1 : index
    %c1_173 = arith.constant 1 : index
    %c0_174 = arith.constant 0 : index
    %c0_175 = arith.constant 0 : index
    %240 = vector.load %arg7[%c1_172, %c1_173, %c0_174, %c0_175] : memref<2x2x32x16xf32, #tpu.memory_space<vmem>>, vector<1x1x32x16xf32>
    %241 = vector.shape_cast %240 : vector<1x1x32x16xf32> to vector<32x16xf32>
    %cst_176 = arith.constant dense<0.000000e+00> : vector<16x16xf32>
    %242 = tpu.matmul %193, %241, %cst_176 {dimension_numbers = #tpu.dot_dimension_numbers<[1], [0], [0], [1], [0, 0, 1, 1], [], []>} : vector<16x32xf32>, vector<32x16xf32>, vector<16x16xf32> -> vector<16x16xf32>
    %c1_177 = arith.constant 1 : index
    %c1_178 = arith.constant 1 : index
    %c0_179 = arith.constant 0 : index
    %c0_180 = arith.constant 0 : index
    %243 = vector.load %arg8[%c1_177, %c1_178, %c0_179, %c0_180] : memref<2x2x1x16xf32, #tpu.memory_space<vmem>>, vector<1x1x1x16xf32>
    %244 = vector.shape_cast %243 : vector<1x1x1x16xf32> to vector<1x16xf32>
    %245 = vector.broadcast %244 : vector<1x16xf32> to vector<16x16xf32>
    %246 = arith.addf %242, %245 : vector<16x16xf32>
    %c1_181 = arith.constant 1 : index
    %c1_182 = arith.constant 1 : index
    %c0_183 = arith.constant 0 : index
    %c0_184 = arith.constant 0 : index
    %247 = vector.load %arg9[%c1_181, %c1_182, %c0_183, %c0_184] : memref<2x2x32x16xf32, #tpu.memory_space<vmem>>, vector<1x1x32x16xf32>
    %248 = vector.shape_cast %247 : vector<1x1x32x16xf32> to vector<32x16xf32>
    %cst_185 = arith.constant dense<0.000000e+00> : vector<16x16xf32>
    %249 = tpu.matmul %193, %248, %cst_185 {dimension_numbers = #tpu.dot_dimension_numbers<[1], [0], [0], [1], [0, 0, 1, 1], [], []>} : vector<16x32xf32>, vector<32x16xf32>, vector<16x16xf32> -> vector<16x16xf32>
    %c1_186 = arith.constant 1 : index
    %c1_187 = arith.constant 1 : index
    %c0_188 = arith.constant 0 : index
    %c0_189 = arith.constant 0 : index
    %250 = vector.load %arg10[%c1_186, %c1_187, %c0_188, %c0_189] : memref<2x2x1x16xf32, #tpu.memory_space<vmem>>, vector<1x1x1x16xf32>
    %251 = vector.shape_cast %250 : vector<1x1x1x16xf32> to vector<1x16xf32>
    %252 = vector.broadcast %251 : vector<1x16xf32> to vector<16x16xf32>
    %253 = arith.addf %249, %252 : vector<16x16xf32>
    %cst_190 = arith.constant dense<0.000000e+00> : vector<16x16xf32>
    %254 = tpu.matmul %239, %246, %cst_190 {dimension_numbers = #tpu.dot_dimension_numbers<[1], [1], [0], [0], [0, 0, 1, 0], [], []>} : vector<16x16xf32>, vector<16x16xf32>, vector<16x16xf32> -> vector<16x16xf32>
    %255 = arith.addf %254, %27 : vector<16x16xf32>
    %cst_191 = arith.constant dense<0xFF800000> : vector<16xf32>
    %256 = vector.multi_reduction <maximumf>, %255, %cst_191 [1] : vector<16x16xf32> to vector<16xf32>
    %257 = vector.shape_cast %256 : vector<16xf32> to vector<16x1xf32>
    %258 = vector.broadcast %257 : vector<16x1xf32> to vector<16x16xf32>
    %259 = arith.subf %255, %258 : vector<16x16xf32>
    %260 = math.exp %259 : vector<16x16xf32>
    %cst_192 = arith.constant dense<0.000000e+00> : vector<16xf32>
    %261 = vector.multi_reduction <add>, %260, %cst_192 [1] : vector<16x16xf32> to vector<16xf32>
    %262 = vector.shape_cast %261 : vector<16xf32> to vector<16x1xf32>
    %263 = tpu.reciprocal %262 {approx = true} : vector<16x1xf32> -> vector<16x1xf32>
    %264 = vector.broadcast %263 : vector<16x1xf32> to vector<16x16xf32>
    %265 = arith.mulf %260, %264 : vector<16x16xf32>
    %cst_193 = arith.constant dense<0.000000e+00> : vector<16x16xf32>
    %266 = tpu.matmul %265, %253, %cst_193 {dimension_numbers = #tpu.dot_dimension_numbers<[1], [0], [0], [1], [0, 0, 1, 1], [], []>} : vector<16x16xf32>, vector<16x16xf32>, vector<16x16xf32> -> vector<16x16xf32>
    %c1_194 = arith.constant 1 : index
    %c1_195 = arith.constant 1 : index
    %c0_196 = arith.constant 0 : index
    %c0_197 = arith.constant 0 : index
    %267 = vector.load %arg11[%c1_194, %c1_195, %c0_196, %c0_197] : memref<2x2x16x32xf32, #tpu.memory_space<vmem>>, vector<1x1x16x32xf32>
    %268 = vector.shape_cast %267 : vector<1x1x16x32xf32> to vector<16x32xf32>
    %cst_198 = arith.constant dense<0.000000e+00> : vector<16x32xf32>
    %269 = tpu.matmul %266, %268, %cst_198 {dimension_numbers = #tpu.dot_dimension_numbers<[1], [0], [0], [1], [0, 0, 1, 1], [], []>} : vector<16x16xf32>, vector<16x32xf32>, vector<16x32xf32> -> vector<16x32xf32>
    %270 = arith.addf %232, %269 : vector<16x32xf32>
    %c1_199 = arith.constant 1 : index
    %c0_200 = arith.constant 0 : index
    %c0_201 = arith.constant 0 : index
    %271 = vector.load %arg12[%c1_199, %c0_200, %c0_201] : memref<2x1x32xf32, #tpu.memory_space<vmem>>, vector<1x1x32xf32>
    %272 = vector.shape_cast %271 : vector<1x1x32xf32> to vector<1x32xf32>
    %273 = vector.broadcast %272 : vector<1x32xf32> to vector<16x32xf32>
    %274 = arith.addf %270, %273 : vector<16x32xf32>
    %275 = arith.addf %274, %193 : vector<16x32xf32>
    %c1_202 = arith.constant 1 : index
    %c0_203 = arith.constant 0 : index
    %c0_204 = arith.constant 0 : index
    %276 = vector.load %arg13[%c1_202, %c0_203, %c0_204] : memref<2x1x32xf32, #tpu.memory_space<vmem>>, vector<1x1x32xf32>
    %277 = vector.shape_cast %276 : vector<1x1x32xf32> to vector<1x32xf32>
    %c1_205 = arith.constant 1 : index
    %c0_206 = arith.constant 0 : index
    %c0_207 = arith.constant 0 : index
    %278 = vector.load %arg14[%c1_205, %c0_206, %c0_207] : memref<2x1x32xf32, #tpu.memory_space<vmem>>, vector<1x1x32xf32>
    %279 = vector.shape_cast %278 : vector<1x1x32xf32> to vector<1x32xf32>
    %cst_208 = arith.constant dense<0.000000e+00> : vector<16xf32>
    %280 = vector.multi_reduction <add>, %275, %cst_208 [1] : vector<16x32xf32> to vector<16xf32>
    %281 = vector.shape_cast %280 : vector<16xf32> to vector<16x1xf32>
    %cst_209 = arith.constant 3.200000e+01 : f32
    %282 = vector.broadcast %cst_209 : f32 to vector<16x1xf32>
    %283 = arith.divf %281, %282 : vector<16x1xf32>
    %284 = vector.broadcast %283 : vector<16x1xf32> to vector<16x32xf32>
    %285 = arith.subf %275, %284 : vector<16x32xf32>
    %286 = vector.broadcast %283 : vector<16x1xf32> to vector<16x32xf32>
    %287 = arith.subf %275, %286 : vector<16x32xf32>
    %288 = arith.mulf %285, %287 : vector<16x32xf32>
    %cst_210 = arith.constant dense<0.000000e+00> : vector<16xf32>
    %289 = vector.multi_reduction <add>, %288, %cst_210 [1] : vector<16x32xf32> to vector<16xf32>
    %290 = vector.shape_cast %289 : vector<16xf32> to vector<16x1xf32>
    %cst_211 = arith.constant 3.200000e+01 : f32
    %291 = vector.broadcast %cst_211 : f32 to vector<16x1xf32>
    %292 = arith.divf %290, %291 : vector<16x1xf32>
    %293 = vector.broadcast %283 : vector<16x1xf32> to vector<16x32xf32>
    %294 = arith.subf %275, %293 : vector<16x32xf32>
    %cst_212 = arith.constant 9.99999996E-13 : f32
    %295 = vector.broadcast %cst_212 : f32 to vector<16x1xf32>
    %296 = arith.addf %292, %295 : vector<16x1xf32>
    %297 = math.rsqrt %296 : vector<16x1xf32>
    %298 = vector.broadcast %297 : vector<16x1xf32> to vector<16x32xf32>
    %299 = arith.mulf %294, %298 : vector<16x32xf32>
    %300 = vector.broadcast %277 : vector<1x32xf32> to vector<16x32xf32>
    %301 = arith.mulf %299, %300 : vector<16x32xf32>
    %302 = vector.broadcast %279 : vector<1x32xf32> to vector<16x32xf32>
    %303 = arith.addf %301, %302 : vector<16x32xf32>
    %c1_213 = arith.constant 1 : index
    %c0_214 = arith.constant 0 : index
    %c0_215 = arith.constant 0 : index
    %304 = vector.load %arg15[%c1_213, %c0_214, %c0_215] : memref<2x32x64xf32, #tpu.memory_space<vmem>>, vector<1x32x64xf32>
    %305 = vector.shape_cast %304 : vector<1x32x64xf32> to vector<32x64xf32>
    %cst_216 = arith.constant dense<0.000000e+00> : vector<16x64xf32>
    %306 = tpu.matmul %303, %305, %cst_216 {dimension_numbers = #tpu.dot_dimension_numbers<[1], [0], [0], [1], [0, 0, 1, 1], [], []>} : vector<16x32xf32>, vector<32x64xf32>, vector<16x64xf32> -> vector<16x64xf32>
    %c1_217 = arith.constant 1 : index
    %c0_218 = arith.constant 0 : index
    %c0_219 = arith.constant 0 : index
    %307 = vector.load %arg16[%c1_217, %c0_218, %c0_219] : memref<2x1x64xf32, #tpu.memory_space<vmem>>, vector<1x1x64xf32>
    %308 = vector.shape_cast %307 : vector<1x1x64xf32> to vector<1x64xf32>
    %309 = vector.broadcast %308 : vector<1x64xf32> to vector<16x64xf32>
    %310 = arith.addf %306, %309 : vector<16x64xf32>
    %cst_220 = arith.constant 5.000000e-01 : f32
    %311 = vector.broadcast %cst_220 : f32 to vector<16x64xf32>
    %312 = arith.mulf %311, %310 : vector<16x64xf32>
    %cst_221 = arith.constant 4.471500e-02 : f32
    %313 = vector.broadcast %cst_221 : f32 to vector<16x64xf32>
    %314 = arith.mulf %313, %310 : vector<16x64xf32>
    %315 = arith.mulf %314, %310 : vector<16x64xf32>
    %316 = arith.mulf %315, %310 : vector<16x64xf32>
    %317 = arith.addf %310, %316 : vector<16x64xf32>
    %cst_222 = arith.constant 0.797884583 : f32
    %318 = vector.broadcast %cst_222 : f32 to vector<16x64xf32>
    %319 = arith.mulf %318, %317 : vector<16x64xf32>
    %320 = math.tanh %319 : vector<16x64xf32>
    %cst_223 = arith.constant 1.000000e+00 : f32
    %321 = vector.broadcast %cst_223 : f32 to vector<16x64xf32>
    %322 = arith.addf %321, %320 : vector<16x64xf32>
    %323 = arith.mulf %312, %322 : vector<16x64xf32>
    %c1_224 = arith.constant 1 : index
    %c0_225 = arith.constant 0 : index
    %c0_226 = arith.constant 0 : index
    %324 = vector.load %arg17[%c1_224, %c0_225, %c0_226] : memref<2x64x32xf32, #tpu.memory_space<vmem>>, vector<1x64x32xf32>
    %325 = vector.shape_cast %324 : vector<1x64x32xf32> to vector<64x32xf32>
    %cst_227 = arith.constant dense<0.000000e+00> : vector<16x32xf32>
    %326 = tpu.matmul %323, %325, %cst_227 {dimension_numbers = #tpu.dot_dimension_numbers<[1], [0], [0], [1], [0, 0, 1, 1], [], []>} : vector<16x64xf32>, vector<64x32xf32>, vector<16x32xf32> -> vector<16x32xf32>
    %c1_228 = arith.constant 1 : index
    %c0_229 = arith.constant 0 : index
    %c0_230 = arith.constant 0 : index
    %327 = vector.load %arg18[%c1_228, %c0_229, %c0_230] : memref<2x1x32xf32, #tpu.memory_space<vmem>>, vector<1x1x32xf32>
    %328 = vector.shape_cast %327 : vector<1x1x32xf32> to vector<1x32xf32>
    %329 = vector.broadcast %328 : vector<1x32xf32> to vector<16x32xf32>
    %330 = arith.addf %326, %329 : vector<16x32xf32>
    %331 = arith.addf %330, %303 : vector<16x32xf32>
    %c1_231 = arith.constant 1 : index
    %c0_232 = arith.constant 0 : index
    %c0_233 = arith.constant 0 : index
    %332 = vector.load %arg19[%c1_231, %c0_232, %c0_233] : memref<2x1x32xf32, #tpu.memory_space<vmem>>, vector<1x1x32xf32>
    %333 = vector.shape_cast %332 : vector<1x1x32xf32> to vector<1x32xf32>
    %c1_234 = arith.constant 1 : index
    %c0_235 = arith.constant 0 : index
    %c0_236 = arith.constant 0 : index
    %334 = vector.load %arg20[%c1_234, %c0_235, %c0_236] : memref<2x1x32xf32, #tpu.memory_space<vmem>>, vector<1x1x32xf32>
    %335 = vector.shape_cast %334 : vector<1x1x32xf32> to vector<1x32xf32>
    %cst_237 = arith.constant dense<0.000000e+00> : vector<16xf32>
    %336 = vector.multi_reduction <add>, %331, %cst_237 [1] : vector<16x32xf32> to vector<16xf32>
    %337 = vector.shape_cast %336 : vector<16xf32> to vector<16x1xf32>
    %cst_238 = arith.constant 3.200000e+01 : f32
    %338 = vector.broadcast %cst_238 : f32 to vector<16x1xf32>
    %339 = arith.divf %337, %338 : vector<16x1xf32>
    %340 = vector.broadcast %339 : vector<16x1xf32> to vector<16x32xf32>
    %341 = arith.subf %331, %340 : vector<16x32xf32>
    %342 = vector.broadcast %339 : vector<16x1xf32> to vector<16x32xf32>
    %343 = arith.subf %331, %342 : vector<16x32xf32>
    %344 = arith.mulf %341, %343 : vector<16x32xf32>
    %cst_239 = arith.constant dense<0.000000e+00> : vector<16xf32>
    %345 = vector.multi_reduction <add>, %344, %cst_239 [1] : vector<16x32xf32> to vector<16xf32>
    %346 = vector.shape_cast %345 : vector<16xf32> to vector<16x1xf32>
    %cst_240 = arith.constant 3.200000e+01 : f32
    %347 = vector.broadcast %cst_240 : f32 to vector<16x1xf32>
    %348 = arith.divf %346, %347 : vector<16x1xf32>
    %349 = vector.broadcast %339 : vector<16x1xf32> to vector<16x32xf32>
    %350 = arith.subf %331, %349 : vector<16x32xf32>
    %cst_241 = arith.constant 9.99999996E-13 : f32
    %351 = vector.broadcast %cst_241 : f32 to vector<16x1xf32>
    %352 = arith.addf %348, %351 : vector<16x1xf32>
    %353 = math.rsqrt %352 : vector<16x1xf32>
    %354 = vector.broadcast %353 : vector<16x1xf32> to vector<16x32xf32>
    %355 = arith.mulf %350, %354 : vector<16x32xf32>
    %356 = vector.broadcast %333 : vector<1x32xf32> to vector<16x32xf32>
    %357 = arith.mulf %355, %356 : vector<16x32xf32>
    %358 = vector.broadcast %335 : vector<1x32xf32> to vector<16x32xf32>
    %359 = arith.addf %357, %358 : vector<16x32xf32>
    %c0_242 = arith.constant 0 : index
    %c0_243 = arith.constant 0 : index
    %360 = vector.load %arg21[%c0_242, %c0_243] : memref<32x128xf32, #tpu.memory_space<vmem>>, vector<32x128xf32>
    %cst_244 = arith.constant dense<0.000000e+00> : vector<16x128xf32>
    %361 = tpu.matmul %359, %360, %cst_244 {dimension_numbers = #tpu.dot_dimension_numbers<[1], [0], [0], [1], [0, 0, 1, 1], [], []>} : vector<16x32xf32>, vector<32x128xf32>, vector<16x128xf32> -> vector<16x128xf32>
    %c0_245 = arith.constant 0 : index
    %c0_246 = arith.constant 0 : index
    %362 = vector.load %arg22[%c0_245, %c0_246] : memref<1x128xf32, #tpu.memory_space<vmem>>, vector<1x128xf32>
    %363 = vector.broadcast %362 : vector<1x128xf32> to vector<16x128xf32>
    %364 = arith.addf %361, %363 : vector<16x128xf32>
    %365 = math.tanh %364 : vector<16x128xf32>
    %c0_247 = arith.constant 0 : index
    %c0_248 = arith.constant 0 : index
    %366 = vector.load %arg26[%c0_247, %c0_248] : memref<16x128xf32, #tpu.memory_space<vmem>>, vector<16x128xf32>
    tpu.vector_store %arg26[%c0_247, %c0_248], %365 {strides = array<i32>} : memref<16x128xf32, #tpu.memory_space<vmem>>, vector<16x128xf32>,
    %c0_249 = arith.constant 0 : index
    %c0_250 = arith.constant 0 : index
    %367 = vector.load %arg23[%c0_249, %c0_250] : memref<128x128xf32, #tpu.memory_space<vmem>>, vector<128x128xf32>
    %cst_251 = arith.constant dense<0.000000e+00> : vector<16x128xf32>
    %368 = tpu.matmul %365, %367, %cst_251 {dimension_numbers = #tpu.dot_dimension_numbers<[1], [0], [0], [1], [0, 0, 1, 1], [], []>} : vector<16x128xf32>, vector<128x128xf32>, vector<16x128xf32> -> vector<16x128xf32>
    %c0_252 = arith.constant 0 : index
    %c0_253 = arith.constant 0 : index
    %369 = vector.load %arg24[%c0_252, %c0_253] : memref<1x128xf32, #tpu.memory_space<vmem>>, vector<1x128xf32>
    %370 = vector.broadcast %369 : vector<1x128xf32> to vector<16x128xf32>
    %371 = arith.addf %368, %370 : vector<16x128xf32>
    %c0_254 = arith.constant 0 : index
    %c0_255 = arith.constant 0 : index
    %372 = vector.load %arg25[%c0_254, %c0_255] : memref<16x128xf32, #tpu.memory_space<vmem>>, vector<16x128xf32>
    tpu.vector_store %arg25[%c0_254, %c0_255], %371 {strides = array<i32>} : memref<16x128xf32, #tpu.memory_space<vmem>>, vector<16x128xf32>,
    return
  }
  func.func @transform_0(%arg0: i32) -> (i32, i32) {
    %c0_i32 = arith.constant 0 : i32
    %c0_i32_0 = arith.constant 0 : i32
    %c0_i32_1 = arith.constant 0 : i32
    return %c0_i32, %c0_i32_0 : i32, i32
  }
  func.func @transform_1(%arg0: i32) -> (i32, i32) {
    %c0_i32 = arith.constant 0 : i32
    %c0_i32_0 = arith.constant 0 : i32
    %c0_i32_1 = arith.constant 0 : i32
    return %c0_i32, %c0_i32_0 : i32, i32
  }
  func.func @transform_2(%arg0: i32) -> (i32, i32) {
    %c0_i32 = arith.constant 0 : i32
    %c0_i32_0 = arith.constant 0 : i32
    %c0_i32_1 = arith.constant 0 : i32
    return %c0_i32, %c0_i32_0 : i32, i32
  }
  func.func @transform_3(%arg0: i32) -> (i32, i32) {
    %c0_i32 = arith.constant 0 : i32
    %c0_i32_0 = arith.constant 0 : i32
    %c0_i32_1 = arith.constant 0 : i32
    return %c0_i32, %c0_i32_0 : i32, i32
  }
  func.func @transform_4(%arg0: i32) -> (i32, i32, i32, i32) {
    %c0_i32 = arith.constant 0 : i32
    %c0_i32_0 = arith.constant 0 : i32
    %c0_i32_1 = arith.constant 0 : i32
    %c0_i32_2 = arith.constant 0 : i32
    %c0_i32_3 = arith.constant 0 : i32
    return %c0_i32, %c0_i32_0, %c0_i32_1, %c0_i32_2 : i32, i32, i32, i32
  }
  func.func @transform_5(%arg0: i32) -> (i32, i32, i32, i32) {
    %c0_i32 = arith.constant 0 : i32
    %c0_i32_0 = arith.constant 0 : i32
    %c0_i32_1 = arith.constant 0 : i32
    %c0_i32_2 = arith.constant 0 : i32
    %c0_i32_3 = arith.constant 0 : i32
    return %c0_i32, %c0_i32_0, %c0_i32_1, %c0_i32_2 : i32, i32, i32, i32
  }
  func.func @transform_6(%arg0: i32) -> (i32, i32, i32, i32) {
    %c0_i32 = arith.constant 0 : i32
    %c0_i32_0 = arith.constant 0 : i32
    %c0_i32_1 = arith.constant 0 : i32
    %c0_i32_2 = arith.constant 0 : i32
    %c0_i32_3 = arith.constant 0 : i32
    return %c0_i32, %c0_i32_0, %c0_i32_1, %c0_i32_2 : i32, i32, i32, i32
  }
  func.func @transform_7(%arg0: i32) -> (i32, i32, i32, i32) {
    %c0_i32 = arith.constant 0 : i32
    %c0_i32_0 = arith.constant 0 : i32
    %c0_i32_1 = arith.constant 0 : i32
    %c0_i32_2 = arith.constant 0 : i32
    %c0_i32_3 = arith.constant 0 : i32
    return %c0_i32, %c0_i32_0, %c0_i32_1, %c0_i32_2 : i32, i32, i32, i32
  }
  func.func @transform_8(%arg0: i32) -> (i32, i32, i32, i32) {
    %c0_i32 = arith.constant 0 : i32
    %c0_i32_0 = arith.constant 0 : i32
    %c0_i32_1 = arith.constant 0 : i32
    %c0_i32_2 = arith.constant 0 : i32
    %c0_i32_3 = arith.constant 0 : i32
    return %c0_i32, %c0_i32_0, %c0_i32_1, %c0_i32_2 : i32, i32, i32, i32
  }
  func.func @transform_9(%arg0: i32) -> (i32, i32, i32, i32) {
    %c0_i32 = arith.constant 0 : i32
    %c0_i32_0 = arith.constant 0 : i32
    %c0_i32_1 = arith.constant 0 : i32
    %c0_i32_2 = arith.constant 0 : i32
    %c0_i32_3 = arith.constant 0 : i32
    return %c0_i32, %c0_i32_0, %c0_i32_1, %c0_i32_2 : i32, i32, i32, i32
  }
  func.func @transform_10(%arg0: i32) -> (i32, i32, i32, i32) {
    %c0_i32 = arith.constant 0 : i32
    %c0_i32_0 = arith.constant 0 : i32
    %c0_i32_1 = arith.constant 0 : i32
    %c0_i32_2 = arith.constant 0 : i32
    %c0_i32_3 = arith.constant 0 : i32
    return %c0_i32, %c0_i32_0, %c0_i32_1, %c0_i32_2 : i32, i32, i32, i32
  }
  func.func @transform_11(%arg0: i32) -> (i32, i32, i32) {
    %c0_i32 = arith.constant 0 : i32
    %c0_i32_0 = arith.constant 0 : i32
    %c0_i32_1 = arith.constant 0 : i32
    %c0_i32_2 = arith.constant 0 : i32
    return %c0_i32, %c0_i32_0, %c0_i32_1 : i32, i32, i32
  }
  func.func @transform_12(%arg0: i32) -> (i32, i32, i32) {
    %c0_i32 = arith.constant 0 : i32
    %c0_i32_0 = arith.constant 0 : i32
    %c0_i32_1 = arith.constant 0 : i32
    %c0_i32_2 = arith.constant 0 : i32
    return %c0_i32, %c0_i32_0, %c0_i32_1 : i32, i32, i32
  }
  func.func @transform_13(%arg0: i32) -> (i32, i32, i32) {
    %c0_i32 = arith.constant 0 : i32
    %c0_i32_0 = arith.constant 0 : i32
    %c0_i32_1 = arith.constant 0 : i32
    %c0_i32_2 = arith.constant 0 : i32
    return %c0_i32, %c0_i32_0, %c0_i32_1 : i32, i32, i32
  }
  func.func @transform_14(%arg0: i32) -> (i32, i32, i32) {
    %c0_i32 = arith.constant 0 : i32
    %c0_i32_0 = arith.constant 0 : i32
    %c0_i32_1 = arith.constant 0 : i32
    %c0_i32_2 = arith.constant 0 : i32
    return %c0_i32, %c0_i32_0, %c0_i32_1 : i32, i32, i32
  }
  func.func @transform_15(%arg0: i32) -> (i32, i32, i32) {
    %c0_i32 = arith.constant 0 : i32
    %c0_i32_0 = arith.constant 0 : i32
    %c0_i32_1 = arith.constant 0 : i32
    %c0_i32_2 = arith.constant 0 : i32
    return %c0_i32, %c0_i32_0, %c0_i32_1 : i32, i32, i32
  }
  func.func @transform_16(%arg0: i32) -> (i32, i32, i32) {
    %c0_i32 = arith.constant 0 : i32
    %c0_i32_0 = arith.constant 0 : i32
    %c0_i32_1 = arith.constant 0 : i32
    %c0_i32_2 = arith.constant 0 : i32
    return %c0_i32, %c0_i32_0, %c0_i32_1 : i32, i32, i32
  }
  func.func @transform_17(%arg0: i32) -> (i32, i32, i32) {
    %c0_i32 = arith.constant 0 : i32
    %c0_i32_0 = arith.constant 0 : i32
    %c0_i32_1 = arith.constant 0 : i32
    %c0_i32_2 = arith.constant 0 : i32
    return %c0_i32, %c0_i32_0, %c0_i32_1 : i32, i32, i32
  }
  func.func @transform_18(%arg0: i32) -> (i32, i32, i32) {
    %c0_i32 = arith.constant 0 : i32
    %c0_i32_0 = arith.constant 0 : i32
    %c0_i32_1 = arith.constant 0 : i32
    %c0_i32_2 = arith.constant 0 : i32
    return %c0_i32, %c0_i32_0, %c0_i32_1 : i32, i32, i32
  }
  func.func @transform_19(%arg0: i32) -> (i32, i32, i32) {
    %c0_i32 = arith.constant 0 : i32
    %c0_i32_0 = arith.constant 0 : i32
    %c0_i32_1 = arith.constant 0 : i32
    %c0_i32_2 = arith.constant 0 : i32
    return %c0_i32, %c0_i32_0, %c0_i32_1 : i32, i32, i32
  }
  func.func @transform_20(%arg0: i32) -> (i32, i32) {
    %c0_i32 = arith.constant 0 : i32
    %c0_i32_0 = arith.constant 0 : i32
    %c0_i32_1 = arith.constant 0 : i32
    return %c0_i32, %c0_i32_0 : i32, i32
  }
  func.func @transform_21(%arg0: i32) -> (i32, i32) {
    %c0_i32 = arith.constant 0 : i32
    %c0_i32_0 = arith.constant 0 : i32
    %c0_i32_1 = arith.constant 0 : i32
    return %c0_i32, %c0_i32_0 : i32, i32
  }
  func.func @transform_22(%arg0: i32) -> (i32, i32) {
    %c0_i32 = arith.constant 0 : i32
    %c0_i32_0 = arith.constant 0 : i32
    %c0_i32_1 = arith.constant 0 : i32
    return %c0_i32, %c0_i32_0 : i32, i32
  }
  func.func @transform_23(%arg0: i32) -> (i32, i32) {
    %c0_i32 = arith.constant 0 : i32
    %c0_i32_0 = arith.constant 0 : i32
    %c0_i32_1 = arith.constant 0 : i32
    return %c0_i32, %c0_i32_0 : i32, i32
  }
  func.func @transform_24(%arg0: i32) -> (i32, i32) {
    %c0_i32 = arith.constant 0 : i32
    %c0_i32_0 = arith.constant 0 : i32
    %c0_i32_1 = arith.constant 0 : i32
    return %c0_i32, %c0_i32_0 : i32, i32
  }
  func.func @transform_25(%arg0: i32) -> (i32, i32) {
    %c0_i32 = arith.constant 0 : i32
    %c0_i32_0 = arith.constant 0 : i32
    %c0_i32_1 = arith.constant 0 : i32
    return %c0_i32, %c0_i32_0 : i32, i32
  }
}

</mosaic_0001>

<bundles_post_ra>
// kernel: bert_classifier_forward.1
= control target key start
LH: loop header
LB: loop body
LE: loop exit
PB: predicated region body
PF: predicated region fallthrough
CT: control target
= control target key end

     0   :  { %vm83_vm0 = vcmask 261120   ;;  %v1798_v4 = vmov 32.0   ;;  %vm246_vm8 = vcmask 130048   ;;  %vm712_vm15 = vcmask 523264   ;;  %s2540_s0 = inlined_call_operand.vmem [shape: f32[16,32], index: 0, kind: input, shape index: {}]   ;;  %s2541_s2 = inlined_call_operand.vmem [shape: f32[1,32], index: 2, kind: input, shape index: {}]   ;;  %s2542_s3 = inlined_call_operand.vmem [shape: f32[1,32], index: 3, kind: input, shape index: {}]   ;;  %s2543_s5 = inlined_call_operand.vmem [shape: f32[2,2,1,16], index: 5, kind: input, shape index: {}]   ;;  %s2544_s4 = inlined_call_operand.vmem [shape: f32[2,2,32,16], index: 4, kind: input, shape index: {}]   ;;  %s2545_s6 = inlined_call_operand.vmem [shape: f32[2,2,32,16], index: 6, kind: input, shape index: {}]   ;;  %s2546_s8 = inlined_call_operand.vmem [shape: f32[2,2,32,16], index: 8, kind: input, shape index: {}]   ;;  %s2547_s7 = inlined_call_operand.vmem [shape: f32[2,2,1,16], index: 7, kind: input, shape index: {}]   ;;  %s2548_s9 = inlined_call_operand.vmem [shape: f32[2,2,1,16], index: 9, kind: input, shape index: {}]   ;;  %s2549_s1 = inlined_call_operand.vmem [shape: f32[16,16], index: 1, kind: input, shape index: {}]   ;;  %s2550_s10 = inlined_call_operand.vmem [shape: f32[2,2,16,32], index: 10, kind: input, shape index: {}]   ;;  %s2551_s11 = inlined_call_operand.vmem [shape: f32[2,1,32], index: 11, kind: input, shape index: {}]   ;;  %s2552_s12 = inlined_call_operand.vmem [shape: f32[2,1,32], index: 12, kind: input, shape index: {}]   ;;  %s2553_s13 = inlined_call_operand.vmem [shape: f32[2,1,32], index: 13, kind: input, shape index: {}]   ;;  %s2554_s15 = inlined_call_operand.vmem [shape: f32[2,1,64], index: 15, kind: input, shape index: {}]   ;;  %s2555_s14 = inlined_call_operand.vmem [shape: f32[2,32,64], index: 14, kind: input, shape index: {}]   ;;  %s2556_s17 = inlined_call_operand.vmem [shape: f32[2,1,32], index: 17, kind: input, shape index: {}]   ;;  %s2557_s16 = inlined_call_operand.vmem [shape: f32[2,64,32], index: 16, kind: input, shape index: {}]   ;;  %s2558_s18 = inlined_call_operand.vmem [shape: f32[2,1,32], index: 18, kind: input, shape index: {}]   ;;  %s2559_s19 = inlined_call_operand.vmem [shape: f32[2,1,32], index: 19, kind: input, shape index: {}]   ;;  %s2560_s21 = inlined_call_operand.vmem [shape: f32[1,128], index: 21, kind: input, shape index: {}]   ;;  %s2561_s20 = inlined_call_operand.vmem [shape: f32[32,128], index: 20, kind: input, shape index: {}]   ;;  %s2562_s22 = inlined_call_operand.vmem [shape: f32[128,128], index: 22, kind: input, shape index: {}]   ;;  %s2563_s23 = inlined_call_operand.vmem [shape: f32[1,128], index: 23, kind: input, shape index: {}]   ;;  %s2564_s25 = inlined_call_operand.vmem [shape: f32[16,128], index: 25, kind: output, shape index: {1}]   ;;  %s2565_s24 = inlined_call_operand.vmem [shape: f32[16,128], index: 24, kind: output, shape index: {0}]  }
   0x1   :  { %2575 = sst [smem:[#allocation2_spill]] %s2540_s0  ;;  %1732 = vrcp.f32 %v1798_v4 }
   0x2   :  { %2576 = sst [smem:[#allocation3_spill]] %s2541_s2 }
   0x3   :  { %2577 = sst [smem:[#allocation4_spill]] %s2542_s3 }
   0x4   :  { %2578 = sst [smem:[#allocation5_spill]] %s2543_s5 }
   0x5   :  { %2579 = sst [smem:[#allocation6_spill]] %s2544_s4 }
   0x6   :  { %2580 = sst [smem:[#allocation7_spill]] %s2545_s6 }
   0x7   :  { %2581 = sst [smem:[#allocation8_spill]] %s2546_s8  ;;  %v1733_v5 = vpop.eup %1732 }
   0x8   :  { %2582 = sst [smem:[#allocation9_spill]] %s2547_s7  ;;  %v91_v6 = vmul.f32 32.0, %v1733_v5  ;;  %vm95_vm1 = vweird.f32 %v1733_v5 }
   0x9   :  { %2583 = sst [smem:[#allocation10_spill]] %s2548_s9 }
   0xa   :  { %2584 = sst [smem:[#allocation11_spill]] %s2549_s1  ;;  %v92_v7 = vsub.f32 1.0, %v91_v6 }
   0xb   :  { %2585 = sst [smem:[#allocation12_spill]] %s2565_s24 }
   0xc   :  { %s2586_s8 = sld [smem:[#allocation2_spill]]  ;;  %v93_v8 = vmul.f32 %v1733_v5, %v92_v7 }
   0xd   :  { %s2587_s2 = sld [smem:[#allocation6_spill]] }
   0xe   :  { %v94_v9 = vadd.f32 %v1733_v5, %v93_v8  ;;  %s2588_s1 = sld [smem:[#allocation7_spill]] }
   0xf   :  { %s2589_s5 = sld [smem:[#allocation8_spill]] }
  0x10   :  { %v1937_v10 = vsel %vm95_vm1, %v1733_v5, %v94_v9  ;;  %s2590_s3 = sld [smem:[#allocation3_spill]] }
  0x11   :  { %s2591_s7 = sld [smem:[#allocation4_spill]] }
  0x12   :  { %v79_v0 = vld [vmem:[%s2586_s8] sm:$0xff]  ;;  %v80_v2 = vld [vmem:[%s2586_s8 + $0x8] sm:$0xff]  ;;  %s2592_s30 = sld [smem:[#allocation9_spill]] }
  0x13   :  { %v84_v1 = vsel %vm83_vm0, %v79_v0, 0.0  ;;  %v87_v3 = vsel %vm83_vm0, %v80_v2, 0.0  ;;  %v150_v21 = vld [vmem:[%s2587_s2 + $0x18] sm:$0xff]  ;;  %v149_v24 = vld [vmem:[%s2587_s2 + $0x10] sm:$0xff]  ;;  %v148_v27 = vld [vmem:[%s2587_s2 + $0x8] sm:$0xff]  ;;  %s2593_s9 = sld [smem:[#allocation5_spill]] }
  0x14   :  { %85 = vadd.xlane.f32.xlu0 %v84_v1  ;;  %v187_v22 = vld [vmem:[%s2588_s1 + $0x18] sm:$0xff]  ;;  %173 = vmatpush.msra.mxu0 %v150_v21  ;;  %v186_v25 = vld [vmem:[%s2588_s1 + $0x10] sm:$0xff]  ;;  %v185_v28 = vld [vmem:[%s2588_s1 + $0x8] sm:$0xff]  ;;  %s2594_s27 = sld [smem:[#allocation10_spill]] }
  0x15   :  { %v1576_v23 = vld [vmem:[%s2587_s2 + $0x38] sm:$0xff]  ;;  %204 = vmatpush.msra.mxu2 %v187_v22  ;;  %v1575_v26 = vld [vmem:[%s2587_s2 + $0x30] sm:$0xff]  ;;  %1697 = vmatpush.msra.mxu3 %v150_v21  ;;  %v1574_v29 = vld [vmem:[%s2587_s2 + $0x28] sm:$0xff]  ;;  %s2595_s29 = sld [smem:[#allocation11_spill]] }
  0x16   :  { %357 = vmatpush.msra.mxu1 %v1576_v23  ;;  %174 = vmatpush.msra.mxu0 %v149_v24  ;;  %v147_v30 = vld [vmem:[%s2587_s2] sm:$0xff]  ;;  %v218_v36 = vld [vmem:[%s2589_s5 + $0x18] sm:$0xff]  ;;  %v217_v37 = vld [vmem:[%s2589_s5 + $0x10] sm:$0xff] }
  0x17   :  { %205 = vmatpush.msra.mxu2 %v186_v25  ;;  %1698 = vmatpush.msra.mxu3 %v149_v24  ;;  %v184_v31 = vld [vmem:[%s2588_s1] sm:$0xff]  ;;  %v216_v39 = vld [vmem:[%s2589_s5 + $0x8] sm:$0xff]  ;;  %v1583_v60 = vld [vmem:[%s2588_s1 + $0x38] sm:$0xff] }
  0x18   :  { %358 = vmatpush.msra.mxu1 %v1575_v26  ;;  %175 = vmatpush.msra.mxu0 %v148_v27  ;;  %v1573_v32 = vld [vmem:[%s2587_s2 + $0x20] sm:$0xff]  ;;  %v1582_v62 = vld [vmem:[%s2588_s1 + $0x30] sm:$0xff]  ;;  %v1581_v1 = vld [vmem:[%s2588_s1 + $0x28] sm:$0xff] }
  0x19   :  { %206 = vmatpush.msra.mxu2 %v185_v28  ;;  %1699 = vmatpush.msra.mxu3 %v148_v27  ;;  %v215_v41 = vld [vmem:[%s2589_s5] sm:$0xff] }
  0x1a   :  { %359 = vmatpush.msra.mxu1 %v1574_v29  ;;  %176 = vmatpush.msra.mxu0 %v147_v30  ;;  %v1702_v51 = vld [vmem:[%s2590_s3] ss:$0 sm:$0xff]  ;;  %v1708_v26 = vld [vmem:[%s2592_s30 + $0x1] ss:$0 sm:$0xff] }
  0x1b   :  { %207 = vmatpush.msra.mxu2 %v184_v31  ;;  %1700 = vmatpush.msra.mxu3 %v147_v30  ;;  %v1703_v54 = vld [vmem:[%s2591_s7] ss:$0 sm:$0xff] }
  0x1c   :  { %88 = vadd.xlane.f32.xlu0 %v87_v3  ;;  %360 = vmatpush.msra.mxu1 %v1573_v32  ;;  %v1580_v3 = vld [vmem:[%s2588_s1 + $0x20] sm:$0xff] }
  0x1d   :  { %235 = vmatpush.msrb.mxu2 %v218_v36  ;;  %v1706_v6 = vld [vmem:[%s2592_s30] ss:$0 sm:$0xff] }
  0x1e   :  { %v1704_v9 = vld [vmem:[%s2593_s9] ss:$0 sm:$0xff] }
  0x1f   :  { %236 = vmatpush.msrb.mxu2 %v217_v37  ;;  %v2082_v30 = vld [vmem:[%s2595_s29] sm:$0xff] }
  0x21   :  { %237 = vmatpush.msrb.mxu2 %v216_v39  ;;  %v1709_v39 = vld [vmem:[%s2594_s27 + $0x1] ss:$0 sm:$0xff] }
  0x23   :  { %238 = vmatpush.msrb.mxu2 %v215_v41 }
  0x87   :  { %v86_v11 = vpop.xlane.xlu0 %85 }
  0x88   :  { %v97_v12 = vmul.f32 %v1937_v10, %v86_v11 }
  0x8a   :  { %v1940_v13 = vsub.f32 %v79_v0, %v97_v12 }
  0x8c   :  { %v101_v14 = vmul.f32 %v1940_v13, %v1940_v13 }
  0x8e   :  { %v103_v15 = vsel %vm83_vm0, %v101_v14, 0.0 }
  0x8f   :  { %104 = vadd.xlane.f32.xlu1 %v103_v15  ;;  %v89_v16 = vpop.xlane.xlu0 %88 }
  0x90   :  { %v98_v17 = vmul.f32 %v1937_v10, %v89_v16  ;;  %v1589_v16 = vld [vmem:[%s2589_s5 + $0x30] sm:$0xff] }
  0x92   :  { %v1946_v18 = vsub.f32 %v80_v2, %v98_v17  ;;  %v1588_v17 = vld [vmem:[%s2589_s5 + $0x28] sm:$0xff] }
  0x94   :  { %v102_v19 = vmul.f32 %v1946_v18, %v1946_v18 }
  0x96   :  { %v106_v20 = vsel %vm83_vm0, %v102_v19, 0.0 }
  0x97   :  { %107 = vadd.xlane.f32.xlu1 %v106_v20  ;;  %v1707_v20 = vld [vmem:[%s2594_s27] ss:$0 sm:$0xff] }
 0x102   :  { %v105_v33 = vpop.xlane.xlu1 %104 }
 0x103   :  { %v109_v34 = vmul.f32 %v105_v33, %v1937_v10 }
 0x105   :  { %v111_v35 = vadd.f32 1e-12, %v109_v34  ;;  %v2089_v34 = vld [vmem:[%s2595_s29 + $0x8] sm:$0xff] }
 0x107   :  { %1734 = vrsqrt.f32 %v111_v35  ;;  %vm119_vm3 = vweird.f32 %v111_v35 }
 0x10a   :  { %v108_v38 = vpop.xlane.xlu1 %107 }
 0x10b   :  { %v110_v40 = vmul.f32 %v108_v38, %v1937_v10 }
 0x10d   :  { %v1735_v42 = vpop.eup %1734  ;;  %v112_v43 = vadd.f32 1e-12, %v110_v40 }
 0x10e   :  { %v114_v44 = vmul.f32 %v1735_v42, %v111_v35  ;;  %vm120_vm2 = vweird.f32 %v1735_v42 }
 0x10f   :  { %1736 = vrsqrt.f32 %v112_v43  ;;  %vm121_vm4 = vmor %vm119_vm3, %vm120_vm2  ;;  %vm129_vm6 = vweird.f32 %v112_v43 }
 0x110   :  { %v115_v45 = vmul.f32 %v1735_v42, %v114_v44 }
 0x112   :  { %v116_v46 = vmul.f32 0.5, %v115_v45 }
 0x114   :  { %v117_v47 = vsub.f32 1.5, %v116_v46 }
 0x115   :  { %v1737_v48 = vpop.eup %1736 }
 0x116   :  { %v118_v49 = vmul.f32 %v1735_v42, %v117_v47  ;;  %v124_v50 = vmul.f32 %v1737_v48, %v112_v43  ;;  %vm130_vm5 = vweird.f32 %v1737_v48 }
 0x117   :  { %vm131_vm7 = vmor %vm129_vm6, %vm130_vm5 }
 0x118   :  { %v122_v52 = vsel %vm121_vm4, %v1735_v42, %v118_v49  ;;  %v125_v53 = vmul.f32 %v1737_v48, %v124_v50 }
 0x119   :  { %v133_v55 = vmul.f32 %v122_v52, %v1940_v13  ;;  %v1590_v13 = vld [vmem:[%s2589_s5 + $0x38] sm:$0xff] }
 0x11a   :  { %v126_v56 = vmul.f32 0.5, %v125_v53 }
 0x11b   :  { %v138_v57 = vmul.f32 %v1702_v51, %v133_v55 }
 0x11c   :  { %v127_v58 = vsub.f32 1.5, %v126_v56 }
 0x11d   :  { %v2008_v59 = vadd.f32 %v1703_v54, %v138_v57 }
 0x11e   :  { %v128_v61 = vmul.f32 %v1737_v48, %v127_v58 }
 0x11f   :  { %1561 = vmatmul.msk.f32.vlgmr.msra.gmra.mxu0 %vm83_vm0, %v2008_v59  ;;  %1563 = vmatmul.msk.f32.vlgmr.msra.gmra.mxu2 %vm83_vm0, %v2008_v59 }
 0x120   :  { %v132_v63 = vsel %vm131_vm7, %v1737_v48, %v128_v61  ;;  %1578 = vmatmul.msk.f32.vlgmr.msra.gmra.mxu1 %vm83_vm0, %v2008_v59  ;;  %390 = vmatpush.msra.mxu2 %v1583_v60 }
 0x121   :  { %v134_v0 = vmul.f32 %v132_v63, %v1946_v18  ;;  %v1587_v18 = vld [vmem:[%s2589_s5 + $0x20] sm:$0xff] }
 0x122   :  { %391 = vmatpush.msra.mxu2 %v1582_v62  ;;  %v1705_v62 = vld [vmem:[%s2593_s9 + $0x1] ss:$0 sm:$0xff] }
 0x123   :  { %v139_v2 = vmul.f32 %v1702_v51, %v134_v0 }
 0x124   :  { %392 = vmatpush.msra.mxu2 %v1581_v1 }
 0x125   :  { %v2029_v4 = vadd.f32 %v1703_v54, %v139_v2  ;;  %v334_v54 = vld [vmem:[%s2550_s10 + $0x8] sm:$0xff]  ;;  %v333_v2 = vld [vmem:[%s2550_s10] sm:$0xff] }
 0x126   :  { %393 = vmatpush.msra.mxu2 %v1580_v3 }
 0x127   :  { %1562 = vmatmul.msk.f32.vlgmr.msra.gmra.mxu3 %vm83_vm0, %v2029_v4  ;;  %1564 = vmatmul.msk.f32.gmra.mxu2 %vm83_vm0, %v2029_v4 }
 0x128   :  { %1579 = vmatmul.msk.f32.gmra.mxu1 %vm83_vm0, %v2029_v4 }
 0x12f   :  { %1565 = vmatmul.msk.f32.vlgmr.msrb.gmra.mxu2 %vm83_vm0, %v2008_v59 }
 0x137   :  { %1566 = vmatmul.msk.f32.gmra.mxu2 %vm83_vm0, %v2029_v4 }
 0x13f   :  { %1585 = vmatmul.msk.f32.vlgmr.msra.gmra.mxu2 %vm83_vm0, %v2008_v59 }
 0x147   :  { %1586 = vmatmul.msk.f32.gmra.mxu2 %vm83_vm0, %v2029_v4 }
 0x19c   :  { %v178_v11 = vpop.f32.mrf.mxu0 }
 0x19d   :  { %v179_v14 = vadd.f32 %v1704_v9, %v178_v11  ;;  %v362_v61 = vpop.f32.mrf.mxu1 }
 0x19e   :  { %v363_v63 = vadd.f32 %v1705_v62, %v362_v61 }
 0x1a2   :  { %v209_v5 = vpop.f32.mrf.mxu2 }
 0x1a3   :  { %v210_v12 = vadd.f32 %v1706_v6, %v209_v5 }
 0x1a5   :  { %v365_v0 = vpop.f32.mrf.mxu1 }
 0x1a6   :  { %v366_v1 = vadd.f32 %v1705_v62, %v365_v0 }
 0x1aa   :  { %v212_v7 = vpop.f32.mrf.mxu2  ;;  %v181_v19 = vpop.f32.mrf.mxu3 }
 0x1ab   :  { %v213_v8 = vadd.f32 %v1706_v6, %v212_v7  ;;  %v182_v21 = vadd.f32 %v1704_v9, %v181_v19 }
 0x1ad   :  { %1567 = vmatpush.xpose.msk.msrb.mxu3 %vm246_vm8, %v213_v8 }
 0x1b1   :  { %1568 = vmatpush.xpose.msk.msrb.mxu3 %vm246_vm8, %v210_v12 }
 0x1b2   :  { %v240_v15 = vpop.f32.mrf.mxu2 }
 0x1b3   :  { %v241_v24 = vadd.f32 %v1707_v20, %v240_v15 }
 0x1b4   :  { %1569 = vmatmul.msk.f32.vlgmr.msrb.gmra.mxu3 %vm246_vm8, %v179_v14 }
 0x1b5   :  { %423 = vmatpush.msra.mxu3 %v1590_v13 }
 0x1b7   :  { %424 = vmatpush.msra.mxu3 %v1589_v16 }
 0x1b9   :  { %425 = vmatpush.msra.mxu3 %v1588_v17 }
 0x1ba   :  { %v243_v22 = vpop.f32.mrf.mxu2 }
 0x1bb   :  { %426 = vmatpush.msra.mxu3 %v1587_v18  ;;  %v244_v23 = vadd.f32 %v1707_v20, %v243_v22 }
 0x1bc   :  { %1570 = vmatmul.msk.f32.gmra.mxu3 %vm246_vm8, %v182_v21 }
 0x1bd   :  { %324 = vmatpush.msrb.mxu0 %v244_v23  ;;  %572 = vmatpush.msrb.mxu3 %v334_v54  ;;  %v1601_v23 = vld [vmem:[%s2550_s10 + $0x18] sm:$0xff] }
 0x1be   :  { %543 = vmatpush.msrb.mxu2 %v1601_v23 }
 0x1bf   :  { %325 = vmatpush.msrb.mxu0 %v241_v24  ;;  %573 = vmatpush.msrb.mxu3 %v333_v2 }
 0x1c2   :  { %v395_v25 = vpop.f32.mrf.mxu2 }
 0x1c3   :  { %v396_v29 = vadd.f32 %v1708_v26, %v395_v25 }
 0x1c4   :  { %1592 = vmatmul.msk.f32.vlgmr.msra.gmra.mxu3 %vm83_vm0, %v2008_v59 }
 0x1ca   :  { %v398_v27 = vpop.f32.mrf.mxu2 }
 0x1cb   :  { %v399_v28 = vadd.f32 %v1708_v26, %v398_v27 }
 0x1cc   :  { %1593 = vmatmul.msk.f32.gmra.mxu3 %vm83_vm0, %v2029_v4 }
 0x1cd   :  { %1594 = vmatpush.xpose.msk.msra.mxu0 %vm246_vm8, %v399_v28 }
 0x1d1   :  { %1595 = vmatpush.xpose.msk.msra.mxu0 %vm246_vm8, %v396_v29 }
 0x237   :  { %v276_v31 = vpop.f32.mrf.mxu3 }
 0x238   :  { %v277_v32 = vadd.f32 %v276_v31, %v2082_v30  ;;  %v1600_v31 = vld [vmem:[%s2550_s10 + $0x10] sm:$0xff] }
 0x239   :  { %544 = vmatpush.msrb.mxu2 %v1600_v31  ;;  %v704_v31 = vld [vmem:[%s2557_s16 + $0x20] sm:$0xff] }
 0x23a   :  { %v282_v33 = vsel %vm246_vm8, %v277_v32, -inf }
 0x23b   :  { %283 = vmax.xlane.f32.xlu2 %v282_v33 }
 0x23f   :  { %v279_v35 = vpop.f32.mrf.mxu3 }
 0x240   :  { %v280_v36 = vadd.f32 %v279_v35, %v2089_v34 }
 0x242   :  { %v285_v37 = vsel %vm246_vm8, %v280_v36, -inf }
 0x243   :  { %286 = vmax.xlane.f32.xlu2 %v285_v37 }
 0x247   :  { %v428_v38 = vpop.f32.mrf.mxu3 }
 0x248   :  { %v429_v42 = vadd.f32 %v1709_v39, %v428_v38 }
 0x24f   :  { %v431_v40 = vpop.f32.mrf.mxu3 }
 0x250   :  { %v432_v41 = vadd.f32 %v1709_v39, %v431_v40 }
 0x252   :  { %511 = vmatpush.msrb.mxu1 %v432_v41 }
 0x254   :  { %512 = vmatpush.msrb.mxu1 %v429_v42 }
 0x2ae   :  { %v284_v43 = vpop.xlane.xlu2 %283 }
 0x2af   :  { %v288_v44 = vsub.f32 %v277_v32, %v284_v43 }
 0x2b1   :  { %v290_v45 = vmul.f32 1.442695, %v288_v44 }
 0x2b3   :  { %1738 = vpow2.f32 %v290_v45 }
 0x2b6   :  { %v287_v46 = vpop.xlane.xlu2 %286 }
 0x2b7   :  { %v289_v47 = vsub.f32 %v280_v36, %v287_v46  ;;  %v1710_v36 = vld [vmem:[%s2551_s11] ss:$0 sm:$0xff] }
 0x2b9   :  { %v1739_v48 = vpop.eup %1738  ;;  %v292_v49 = vmul.f32 1.442695, %v289_v47 }
 0x2ba   :  { %v294_v50 = vsel %vm246_vm8, %v1739_v48, 0.0 }
 0x2bb   :  { %1740 = vpow2.f32 %v292_v49  ;;  %295 = vadd.xlane.f32.xlu0 %v294_v50 }
 0x2c1   :  { %v1741_v51 = vpop.eup %1740 }
 0x2c2   :  { %v297_v52 = vsel %vm246_vm8, %v1741_v51, 0.0 }
 0x2c3   :  { %298 = vadd.xlane.f32.xlu1 %v297_v52 }
 0x32e   :  { %v296_v53 = vpop.xlane.xlu0 %295 }
 0x32f   :  { %1742 = vrcp.f32 %v296_v53 }
 0x335   :  { %v1743_v55 = vpop.eup %1742 }
 0x336   :  { %v299_v56 = vpop.xlane.xlu1 %298  ;;  %v302_v57 = vmul.f32 %v1743_v55, %v1739_v48 }
 0x337   :  { %1744 = vrcp.f32 %v299_v56 }
 0x338   :  { %1571 = vmatmul.msk.f32.vlgmr.msrb.gmra.mxu0 %vm246_vm8, %v302_v57  ;;  %v647_v57 = vld [vmem:[%s2555_s14 + $0x10] sm:$0xff] }
 0x33d   :  { %v1745_v58 = vpop.eup %1744 }
 0x33e   :  { %v303_v60 = vmul.f32 %v1745_v58, %v1741_v51  ;;  %v646_v58 = vld [vmem:[%s2555_s14 + $0x8] sm:$0xff] }
 0x340   :  { %1572 = vmatmul.msk.f32.gmra.mxu0 %vm246_vm8, %v303_v60  ;;  %v645_v60 = vld [vmem:[%s2555_s14] sm:$0xff] }
 0x348   :  { %1596 = vmatmul.msk.f32.vlgmr.msra.gmra.mxu0 %vm246_vm8, %v363_v63 }
 0x350   :  { %1597 = vmatmul.msk.f32.gmra.mxu0 %vm246_vm8, %v366_v1 }
 0x3b5   :  { %v327_v3 = vpop.f32.mrf.mxu0 }
 0x3b6   :  { %1604 = vmatmul.msk.f32.vlgmr.msrb.gmra.mxu3 %vm246_vm8, %v327_v3 }
 0x3bd   :  { %v330_v5 = vpop.f32.mrf.mxu0 }
 0x3be   :  { %1605 = vmatmul.msk.f32.gmra.mxu3 %vm246_vm8, %v330_v5 }
 0x3c5   :  { %v463_v6 = vpop.f32.mrf.mxu0 }
 0x3c6   :  { %v464_v7 = vadd.f32 %v463_v6, %v2082_v30 }
 0x3c8   :  { %v469_v8 = vsel %vm246_vm8, %v464_v7, -inf }
 0x3c9   :  { %470 = vmax.xlane.f32.xlu2 %v469_v8 }
 0x3cd   :  { %v466_v9 = vpop.f32.mrf.mxu0 }
 0x3ce   :  { %v467_v11 = vadd.f32 %v466_v9, %v2089_v34 }
 0x3d0   :  { %v472_v12 = vsel %vm246_vm8, %v467_v11, -inf }
 0x3d1   :  { %473 = vmax.xlane.f32.xlu0 %v472_v12 }
 0x439   :  { %v575_v35 = vpop.f32.mrf.mxu3 }
 0x43c   :  { %v471_v13 = vpop.xlane.xlu2 %470 }
 0x43d   :  { %v475_v14 = vsub.f32 %v464_v7, %v471_v13  ;;  %v1711_v13 = vld [vmem:[%s2552_s12] ss:$0 sm:$0xff] }
 0x43f   :  { %v477_v15 = vmul.f32 1.442695, %v475_v14 }
 0x441   :  { %1746 = vpow2.f32 %v477_v15  ;;  %v578_v42 = vpop.f32.mrf.mxu3 }
 0x444   :  { %v474_v16 = vpop.xlane.xlu0 %473 }
 0x445   :  { %v476_v17 = vsub.f32 %v467_v11, %v474_v16 }
 0x447   :  { %v1747_v18 = vpop.eup %1746  ;;  %v479_v19 = vmul.f32 1.442695, %v476_v17  ;;  %v1712_v17 = vld [vmem:[%s2553_s13] ss:$0 sm:$0xff] }
 0x448   :  { %v481_v20 = vsel %vm246_vm8, %v1747_v18, 0.0 }
 0x449   :  { %1748 = vpow2.f32 %v479_v19  ;;  %482 = vadd.xlane.f32.xlu1 %v481_v20 }
 0x44f   :  { %v1749_v21 = vpop.eup %1748 }
 0x450   :  { %v484_v22 = vsel %vm246_vm8, %v1749_v21, 0.0 }
 0x451   :  { %485 = vadd.xlane.f32.xlu2 %v484_v22 }
 0x4bc   :  { %v483_v24 = vpop.xlane.xlu1 %482 }
 0x4bd   :  { %1750 = vrcp.f32 %v483_v24 }
 0x4c3   :  { %v1751_v25 = vpop.eup %1750 }
 0x4c4   :  { %v486_v26 = vpop.xlane.xlu2 %485  ;;  %v489_v27 = vmul.f32 %v1751_v25, %v1747_v18 }
 0x4c5   :  { %1752 = vrcp.f32 %v486_v26 }
 0x4c6   :  { %1598 = vmatmul.msk.f32.vlgmr.msrb.gmra.mxu1 %vm246_vm8, %v489_v27  ;;  %v707_v27 = vld [vmem:[%s2557_s16 + $0x38] sm:$0xff] }
 0x4c7   :  { %727 = vmatpush.msra.mxu1 %v707_v27  ;;  %v1624_v27 = vld [vmem:[%s2589_s5 + $0x40] sm:$0xff] }
 0x4cb   :  { %v1753_v28 = vpop.eup %1752 }
 0x4cc   :  { %v490_v29 = vmul.f32 %v1753_v28, %v1749_v21  ;;  %v706_v28 = vld [vmem:[%s2557_s16 + $0x30] sm:$0xff] }
 0x4cd   :  { %728 = vmatpush.msra.mxu1 %v706_v28 }
 0x4ce   :  { %1599 = vmatmul.msk.f32.gmra.mxu1 %vm246_vm8, %v490_v29  ;;  %v705_v29 = vld [vmem:[%s2557_s16 + $0x28] sm:$0xff] }
 0x4cf   :  { %729 = vmatpush.msra.mxu1 %v705_v29 }
 0x4d1   :  { %730 = vmatpush.msra.mxu1 %v704_v31 }
 0x543   :  { %v514_v32 = vpop.f32.mrf.mxu1 }
 0x544   :  { %1602 = vmatmul.msk.f32.vlgmr.msrb.gmra.mxu2 %vm246_vm8, %v514_v32  ;;  %v703_v32 = vld [vmem:[%s2557_s16 + $0x18] sm:$0xff] }
 0x545   :  { %731 = vmatpush.msra.mxu1 %v703_v32  ;;  %v1642_v32 = vld [vmem:[%s2587_s2 + $0x78] sm:$0xff] }
 0x54b   :  { %v517_v33 = vpop.f32.mrf.mxu1 }
 0x54c   :  { %1603 = vmatmul.msk.f32.gmra.mxu2 %vm246_vm8, %v517_v33  ;;  %v702_v33 = vld [vmem:[%s2557_s16 + $0x10] sm:$0xff] }
 0x54d   :  { %732 = vmatpush.msra.mxu1 %v702_v33  ;;  %v1649_v33 = vld [vmem:[%s2588_s1 + $0x78] sm:$0xff] }
 0x5c7   :  { %v546_v37 = vpop.f32.mrf.mxu2 }
 0x5c8   :  { %v576_v38 = vadd.f32 %v575_v35, %v546_v37  ;;  %v701_v35 = vld [vmem:[%s2557_s16 + $0x8] sm:$0xff]  ;;  %v1713_v37 = vld [vmem:[%s2554_s15] ss:$0 sm:$0xff] }
 0x5c9   :  { %733 = vmatpush.msra.mxu1 %v701_v35  ;;  %v1641_v35 = vld [vmem:[%s2587_s2 + $0x70] sm:$0xff] }
 0x5ca   :  { %v585_v39 = vadd.f32 %v1710_v36, %v576_v38 }
 0x5cc   :  { %v587_v40 = vadd.f32 %v585_v39, %v2008_v59 }
 0x5ce   :  { %v591_v41 = vsel %vm83_vm0, %v587_v40, 0.0 }
 0x5cf   :  { %592 = vadd.xlane.f32.xlu0 %v591_v41  ;;  %v549_v43 = vpop.f32.mrf.mxu2 }
 0x5d0   :  { %v579_v44 = vadd.f32 %v578_v42, %v549_v43 }
 0x5d2   :  { %v586_v45 = vadd.f32 %v1710_v36, %v579_v44  ;;  %v700_v36 = vld [vmem:[%s2557_s16] sm:$0xff] }
 0x5d3   :  { %734 = vmatpush.msra.mxu1 %v700_v36  ;;  %v1648_v36 = vld [vmem:[%s2588_s1 + $0x70] sm:$0xff] }
 0x5d4   :  { %v588_v46 = vadd.f32 %v586_v45, %v2029_v4  ;;  %v648_v4 = vld [vmem:[%s2555_s14 + $0x18] sm:$0xff] }
 0x5d5   :  { %671 = vmatpush.msrb.mxu0 %v648_v4 }
 0x5d6   :  { %v594_v47 = vsel %vm83_vm0, %v588_v46, 0.0 }
 0x5d7   :  { %595 = vadd.xlane.f32.xlu1 %v594_v47  ;;  %672 = vmatpush.msrb.mxu0 %v647_v57 }
 0x5d9   :  { %673 = vmatpush.msrb.mxu0 %v646_v58  ;;  %v1714_v58 = vld [vmem:[%s2556_s17] ss:$0 sm:$0xff] }
 0x5db   :  { %674 = vmatpush.msrb.mxu0 %v645_v60 }
 0x642   :  { %v593_v48 = vpop.xlane.xlu0 %592 }
 0x643   :  { %v597_v49 = vmul.f32 %v593_v48, %v1937_v10 }
 0x645   :  { %v599_v50 = vsub.f32 %v587_v40, %v597_v49 }
 0x647   :  { %v601_v51 = vmul.f32 %v599_v50, %v599_v50 }
 0x649   :  { %v603_v52 = vsel %vm83_vm0, %v601_v51, 0.0 }
 0x64a   :  { %604 = vadd.xlane.f32.xlu2 %v603_v52  ;;  %v596_v59 = vpop.xlane.xlu1 %595 }
 0x64b   :  { %v598_v53 = vmul.f32 %v596_v59, %v1937_v10 }
 0x64d   :  { %v600_v54 = vsub.f32 %v588_v46, %v598_v53 }
 0x64f   :  { %v602_v55 = vmul.f32 %v600_v54, %v600_v54 }
 0x651   :  { %v606_v56 = vsel %vm83_vm0, %v602_v55, 0.0 }
 0x652   :  { %607 = vadd.xlane.f32.xlu0 %v606_v56 }
 0x6bd   :  { %v605_v61 = vpop.xlane.xlu2 %604 }
 0x6be   :  { %v609_v62 = vmul.f32 %v605_v61, %v1937_v10 }
 0x6c0   :  { %v611_v63 = vadd.f32 1e-12, %v609_v62 }
 0x6c2   :  { %1754 = vrsqrt.f32 %v611_v63  ;;  %vm619_vm10 = vweird.f32 %v611_v63 }
 0x6c5   :  { %v608_v0 = vpop.xlane.xlu0 %607 }
 0x6c6   :  { %v610_v1 = vmul.f32 %v608_v0, %v1937_v10 }
 0x6c8   :  { %v1755_v2 = vpop.eup %1754  ;;  %v612_v3 = vadd.f32 1e-12, %v610_v1 }
 0x6c9   :  { %v614_v5 = vmul.f32 %v1755_v2, %v611_v63  ;;  %vm620_vm9 = vweird.f32 %v1755_v2 }
 0x6ca   :  { %1756 = vrsqrt.f32 %v612_v3  ;;  %vm621_vm11 = vmor %vm619_vm10, %vm620_vm9  ;;  %vm629_vm13 = vweird.f32 %v612_v3 }
 0x6cb   :  { %v615_v6 = vmul.f32 %v1755_v2, %v614_v5 }
 0x6cd   :  { %v616_v7 = vmul.f32 0.5, %v615_v6 }
 0x6cf   :  { %v617_v8 = vsub.f32 1.5, %v616_v7 }
 0x6d0   :  { %v1757_v9 = vpop.eup %1756 }
 0x6d1   :  { %v618_v11 = vmul.f32 %v1755_v2, %v617_v8  ;;  %v624_v12 = vmul.f32 %v1757_v9, %v612_v3  ;;  %vm630_vm12 = vweird.f32 %v1757_v9 }
 0x6d2   :  { %vm631_vm14 = vmor %vm629_vm13, %vm630_vm12 }
 0x6d3   :  { %v622_v14 = vsel %vm621_vm11, %v1755_v2, %v618_v11  ;;  %v625_v15 = vmul.f32 %v1757_v9, %v624_v12 }
 0x6d4   :  { %v633_v16 = vmul.f32 %v622_v14, %v599_v50 }
 0x6d5   :  { %v626_v18 = vmul.f32 0.5, %v625_v15 }
 0x6d6   :  { %v638_v19 = vmul.f32 %v1711_v13, %v633_v16  ;;  %v1613_v16 = vld [vmem:[%s2587_s2 + $0x58] sm:$0xff] }
 0x6d7   :  { %v627_v20 = vsub.f32 1.5, %v626_v18  ;;  %v1627_v18 = vld [vmem:[%s2589_s5 + $0x58] sm:$0xff]  ;;  %828 = vmatpush.msra.mxu2 %v1613_v16 }
 0x6d8   :  { %v643_v21 = vadd.f32 %v1712_v17, %v638_v19  ;;  %894 = vmatpush.msra.mxu0 %v1627_v18  ;;  %v1612_v19 = vld [vmem:[%s2587_s2 + $0x50] sm:$0xff]  ;;  %v1656_v16 = vld [vmem:[%s2589_s5 + $0x78] sm:$0xff] }
 0x6d9   :  { %v628_v22 = vmul.f32 %v1757_v9, %v627_v20  ;;  %v1619_v20 = vld [vmem:[%s2588_s1 + $0x50] sm:$0xff]  ;;  %829 = vmatpush.msra.mxu2 %v1612_v19  ;;  %v1720_v19 = vld [vmem:[%s2592_s30 + $0x3] ss:$0 sm:$0xff] }
 0x6da   :  { %1606 = vmatmul.msk.f32.vlgmr.msrb.gmra.mxu0 %vm83_vm0, %v643_v21  ;;  %v1655_v18 = vld [vmem:[%s2589_s5 + $0x70] sm:$0xff] }
 0x6db   :  { %v632_v23 = vsel %vm631_vm14, %v1757_v9, %v628_v22  ;;  %v1611_v22 = vld [vmem:[%s2587_s2 + $0x48] sm:$0xff] }
 0x6dc   :  { %v634_v24 = vmul.f32 %v632_v23, %v600_v54  ;;  %v1618_v23 = vld [vmem:[%s2588_s1 + $0x48] sm:$0xff]  ;;  %830 = vmatpush.msra.mxu2 %v1611_v22 }
 0x6de   :  { %v639_v25 = vmul.f32 %v1711_v13, %v634_v24  ;;  %v1625_v24 = vld [vmem:[%s2589_s5 + $0x48] sm:$0xff] }
 0x6e0   :  { %v644_v26 = vadd.f32 %v1712_v17, %v639_v25  ;;  %v1620_v17 = vld [vmem:[%s2588_s1 + $0x58] sm:$0xff]  ;;  %v1610_v25 = vld [vmem:[%s2587_s2 + $0x40] sm:$0xff] }
 0x6e1   :  { %861 = vmatpush.msra.mxu3 %v1620_v17  ;;  %831 = vmatpush.msra.mxu2 %v1610_v25 }
 0x6e2   :  { %1607 = vmatmul.msk.f32.gmra.mxu0 %vm83_vm0, %v644_v26 }
 0x6e3   :  { %862 = vmatpush.msra.mxu3 %v1619_v20  ;;  %v1654_v20 = vld [vmem:[%s2589_s5 + $0x68] sm:$0xff] }
 0x6e5   :  { %863 = vmatpush.msra.mxu3 %v1618_v23  ;;  %v1653_v23 = vld [vmem:[%s2589_s5 + $0x60] sm:$0xff] }
 0x757   :  { %v676_v38 = vpop.f32.mrf.mxu0 }
 0x758   :  { %v677_v39 = vadd.f32 %v1713_v37, %v676_v38  ;;  %v1640_v38 = vld [vmem:[%s2587_s2 + $0x68] sm:$0xff] }
 0x75a   :  { %v684_v40 = vmul.f32 0.044715, %v677_v39  ;;  %v682_v59 = vmul.f32 0.5, %v677_v39 }
 0x75c   :  { %v686_v41 = vmul.f32 %v684_v40, %v677_v39 }
 0x75e   :  { %v688_v42 = vmul.f32 %v686_v41, %v677_v39  ;;  %v1639_v41 = vld [vmem:[%s2587_s2 + $0x60] sm:$0xff] }
 0x75f   :  { %v679_v43 = vpop.f32.mrf.mxu0 }
 0x760   :  { %v690_v44 = vadd.f32 %v688_v42, %v677_v39  ;;  %v680_v45 = vadd.f32 %v1713_v37, %v679_v43  ;;  %v1647_v39 = vld [vmem:[%s2588_s1 + $0x68] sm:$0xff]  ;;  %v1646_v42 = vld [vmem:[%s2588_s1 + $0x60] sm:$0xff] }
 0x762   :  { %v692_v46 = vmul.f32 0.7978846, %v690_v44  ;;  %v685_v47 = vmul.f32 0.044715, %v680_v45  ;;  %v683_v56 = vmul.f32 0.5, %v680_v45 }
 0x764   :  { %1758 = vtanh.f32 %v692_v46  ;;  %v687_v48 = vmul.f32 %v685_v47, %v680_v45 }
 0x766   :  { %v689_v49 = vmul.f32 %v687_v48, %v680_v45 }
 0x768   :  { %v691_v50 = vadd.f32 %v689_v49, %v680_v45 }
 0x76a   :  { %v1759_v51 = vpop.eup %1758  ;;  %v693_v52 = vmul.f32 0.7978846, %v691_v50 }
 0x76b   :  { %v696_v53 = vadd.f32 1.0, %v1759_v51 }
 0x76c   :  { %1760 = vtanh.f32 %v693_v52  ;;  %v1715_v52 = vld [vmem:[%s2558_s18] ss:$0 sm:$0xff] }
 0x76d   :  { %v698_v54 = vmul.f32 %v696_v53, %v682_v59 }
 0x76f   :  { %1608 = vmatmul.msk.f32.vlgmr.msra.gmra.mxu1 %vm712_vm15, %v698_v54  ;;  %v1716_v54 = vld [vmem:[%s2559_s19] ss:$0 sm:$0xff] }
 0x772   :  { %v1761_v55 = vpop.eup %1760 }
 0x773   :  { %v697_v4 = vadd.f32 1.0, %v1761_v55 }
 0x775   :  { %v699_v57 = vmul.f32 %v697_v4, %v683_v56 }
 0x777   :  { %1609 = vmatmul.msk.f32.gmra.mxu1 %vm712_vm15, %v699_v57 }
 0x7ec   :  { %v736_v60 = vpop.f32.mrf.mxu1 }
 0x7ed   :  { %v737_v61 = vadd.f32 %v1714_v58, %v736_v60 }
 0x7ef   :  { %v742_v62 = vadd.f32 %v737_v61, %v643_v21  ;;  %v1626_v21 = vld [vmem:[%s2589_s5 + $0x50] sm:$0xff] }
 0x7f0   :  { %895 = vmatpush.msra.mxu0 %v1626_v21 }
 0x7f1   :  { %v746_v63 = vsel %vm83_vm0, %v742_v62, 0.0 }
 0x7f2   :  { %747 = vadd.xlane.f32.xlu1 %v746_v63  ;;  %896 = vmatpush.msra.mxu0 %v1625_v24 }
 0x7f4   :  { %v739_v0 = vpop.f32.mrf.mxu1  ;;  %897 = vmatpush.msra.mxu0 %v1624_v27 }
 0x7f5   :  { %v740_v1 = vadd.f32 %v1714_v58, %v739_v0 }
 0x7f6   :  { %1049 = vmatpush.msrb.mxu0 %v1649_v33 }
 0x7f7   :  { %v743_v2 = vadd.f32 %v740_v1, %v644_v26  ;;  %v1617_v26 = vld [vmem:[%s2588_s1 + $0x40] sm:$0xff] }
 0x7f8   :  { %864 = vmatpush.msra.mxu3 %v1617_v26  ;;  %1050 = vmatpush.msrb.mxu0 %v1648_v36  ;;  %v1722_v36 = vld [vmem:[%s2594_s27 + $0x3] ss:$0 sm:$0xff] }
 0x7f9   :  { %v749_v3 = vsel %vm83_vm0, %v743_v2, 0.0 }
 0x7fa   :  { %750 = vadd.xlane.f32.xlu2 %v749_v3  ;;  %1016 = vmatpush.msrb.mxu3 %v1642_v32  ;;  %v1717_v3 = vld [vmem:[%s2594_s27 + $0x2] ss:$0 sm:$0xff] }
 0x7fb   :  { %1051 = vmatpush.msrb.mxu0 %v1647_v39 }
 0x7fc   :  { %1017 = vmatpush.msrb.mxu3 %v1641_v35 }
 0x7fd   :  { %1052 = vmatpush.msrb.mxu0 %v1646_v42 }
 0x7fe   :  { %1018 = vmatpush.msrb.mxu3 %v1640_v38 }
 0x800   :  { %1019 = vmatpush.msrb.mxu3 %v1639_v41 }
 0x865   :  { %v748_v5 = vpop.xlane.xlu1 %747 }
 0x866   :  { %v752_v6 = vmul.f32 %v748_v5, %v1937_v10 }
 0x868   :  { %v2197_v7 = vsub.f32 %v742_v62, %v752_v6 }
 0x86a   :  { %v756_v8 = vmul.f32 %v2197_v7, %v2197_v7 }
 0x86c   :  { %v758_v9 = vsel %vm83_vm0, %v756_v8, 0.0  ;;  %v1719_v8 = vld [vmem:[%s2592_s30 + $0x2] ss:$0 sm:$0xff] }
 0x86d   :  { %v751_v11 = vpop.xlane.xlu2 %750  ;;  %759 = vadd.xlane.f32.xlu0 %v758_v9 }
 0x86e   :  { %v753_v12 = vmul.f32 %v751_v11, %v1937_v10 }
 0x870   :  { %v2203_v13 = vsub.f32 %v743_v2, %v753_v12 }
 0x872   :  { %v757_v14 = vmul.f32 %v2203_v13, %v2203_v13 }
 0x874   :  { %v761_v15 = vsel %vm83_vm0, %v757_v14, 0.0  ;;  %v1718_v14 = vld [vmem:[%s2593_s9 + $0x2] ss:$0 sm:$0xff] }
 0x875   :  { %762 = vadd.xlane.f32.xlu1 %v761_v15 }
 0x8e0   :  { %v760_v28 = vpop.xlane.xlu0 %759 }
 0x8e1   :  { %v764_v29 = vmul.f32 %v760_v28, %v1937_v10 }
 0x8e3   :  { %v766_v31 = vadd.f32 1e-12, %v764_v29 }
 0x8e5   :  { %1762 = vrsqrt.f32 %v766_v31  ;;  %vm774_vm2 = vweird.f32 %v766_v31 }
 0x8e8   :  { %v763_v37 = vpop.xlane.xlu1 %762 }
 0x8e9   :  { %v765_v40 = vmul.f32 %v763_v37, %v1937_v10 }
 0x8eb   :  { %v1763_v43 = vpop.eup %1762  ;;  %v767_v44 = vadd.f32 1e-12, %v765_v40 }
 0x8ec   :  { %v769_v45 = vmul.f32 %v1763_v43, %v766_v31  ;;  %vm775_vm1 = vweird.f32 %v1763_v43 }
 0x8ed   :  { %1764 = vrsqrt.f32 %v767_v44  ;;  %vm776_vm3 = vmor %vm774_vm2, %vm775_vm1  ;;  %vm784_vm5 = vweird.f32 %v767_v44 }
 0x8ee   :  { %v770_v46 = vmul.f32 %v1763_v43, %v769_v45 }
 0x8f0   :  { %v771_v47 = vmul.f32 0.5, %v770_v46 }
 0x8f2   :  { %v772_v48 = vsub.f32 1.5, %v771_v47 }
 0x8f3   :  { %v1765_v49 = vpop.eup %1764 }
 0x8f4   :  { %v773_v50 = vmul.f32 %v1763_v43, %v772_v48  ;;  %v779_v51 = vmul.f32 %v1765_v49, %v767_v44  ;;  %vm785_vm4 = vweird.f32 %v1765_v49 }
 0x8f5   :  { %vm786_vm6 = vmor %vm784_vm5, %vm785_vm4 }
 0x8f6   :  { %v777_v59 = vsel %vm776_vm3, %v1763_v43, %v773_v50  ;;  %v780_v53 = vmul.f32 %v1765_v49, %v779_v51  ;;  %v1638_v51 = vld [vmem:[%s2550_s10 + $0x28] sm:$0xff] }
 0x8f7   :  { %v788_v55 = vmul.f32 %v777_v59, %v2197_v7 }
 0x8f8   :  { %v781_v56 = vmul.f32 0.5, %v780_v53 }
 0x8f9   :  { %v793_v4 = vmul.f32 %v1715_v52, %v788_v55 }
 0x8fa   :  { %v782_v57 = vsub.f32 1.5, %v781_v56 }
 0x8fb   :  { %v2277_v58 = vadd.f32 %v1716_v54, %v793_v4  ;;  %v1721_v4 = vld [vmem:[%s2593_s9 + $0x3] ss:$0 sm:$0xff] }
 0x8fc   :  { %v783_v60 = vmul.f32 %v1765_v49, %v782_v57 }
 0x8fd   :  { %1615 = vmatmul.msk.f32.vlgmr.msra.gmra.mxu2 %vm83_vm0, %v2277_v58  ;;  %1622 = vmatmul.msk.f32.vlgmr.msra.gmra.mxu3 %vm83_vm0, %v2277_v58 }
 0x8fe   :  { %v787_v61 = vsel %vm786_vm6, %v1765_v49, %v783_v60  ;;  %1629 = vmatmul.msk.f32.vlgmr.msra.gmra.mxu0 %vm83_vm0, %v2277_v58 }
 0x8ff   :  { %v789_v62 = vmul.f32 %v787_v61, %v2203_v13 }
 0x901   :  { %v794_v63 = vmul.f32 %v1715_v52, %v789_v62  ;;  %v1637_v62 = vld [vmem:[%s2550_s10 + $0x20] sm:$0xff] }
 0x903   :  { %v2286_v0 = vadd.f32 %v1716_v54, %v794_v63 }
 0x905   :  { %1616 = vmatmul.msk.f32.gmra.mxu2 %vm83_vm0, %v2286_v0  ;;  %1623 = vmatmul.msk.f32.gmra.mxu3 %vm83_vm0, %v2286_v0 }
 0x906   :  { %1630 = vmatmul.msk.f32.gmra.mxu0 %vm83_vm0, %v2286_v0 }
 0x90d   :  { %1644 = vmatmul.msk.f32.vlgmr.msrb.gmra.mxu3 %vm83_vm0, %v2277_v58 }
 0x90e   :  { %1651 = vmatmul.msk.f32.vlgmr.msrb.gmra.mxu0 %vm83_vm0, %v2277_v58 }
 0x915   :  { %1645 = vmatmul.msk.f32.gmra.mxu3 %vm83_vm0, %v2286_v0 }
 0x916   :  { %1652 = vmatmul.msk.f32.gmra.mxu0 %vm83_vm0, %v2286_v0 }
 0x97b   :  { %v899_v1 = vpop.f32.mrf.mxu0 }
 0x97c   :  { %v900_v7 = vadd.f32 %v1717_v3, %v899_v1 }
 0x980   :  { %v866_v2 = vpop.f32.mrf.mxu3  ;;  %v833_v12 = vpop.f32.mrf.mxu2 }
 0x981   :  { %v867_v15 = vadd.f32 %v1719_v8, %v866_v2  ;;  %v834_v17 = vadd.f32 %v1718_v14, %v833_v12 }
 0x983   :  { %v902_v5 = vpop.f32.mrf.mxu0 }
 0x984   :  { %v903_v6 = vadd.f32 %v1717_v3, %v902_v5 }
 0x986   :  { %982 = vmatpush.msrb.mxu2 %v903_v6 }
 0x988   :  { %983 = vmatpush.msrb.mxu2 %v900_v7  ;;  %v869_v9 = vpop.f32.mrf.mxu3  ;;  %v836_v24 = vpop.f32.mrf.mxu2 }
 0x989   :  { %v870_v11 = vadd.f32 %v1719_v8, %v869_v9  ;;  %v837_v25 = vadd.f32 %v1718_v14, %v836_v24 }
 0x98b   :  { %v1054_v13 = vpop.f32.mrf.mxu0  ;;  %1631 = vmatpush.xpose.msk.msrb.mxu1 %vm246_vm8, %v870_v11 }
 0x98c   :  { %v1055_v26 = vadd.f32 %v1720_v19, %v1054_v13 }
 0x98f   :  { %1632 = vmatpush.xpose.msk.msrb.mxu1 %vm246_vm8, %v867_v15 }
 0x990   :  { %v1021_v56 = vpop.f32.mrf.mxu3 }
 0x991   :  { %v1022_v57 = vadd.f32 %v1721_v4, %v1021_v56 }
 0x992   :  { %1633 = vmatmul.msk.f32.vlgmr.msrb.gmra.mxu1 %vm246_vm8, %v834_v17 }
 0x993   :  { %1082 = vmatpush.msra.mxu1 %v1656_v16  ;;  %v1057_v21 = vpop.f32.mrf.mxu0 }
 0x994   :  { %v1058_v22 = vadd.f32 %v1720_v19, %v1057_v21 }
 0x995   :  { %1083 = vmatpush.msra.mxu1 %v1655_v18 }
 0x996   :  { %1660 = vmatpush.xpose.msk.msra.mxu2 %vm246_vm8, %v1058_v22 }
 0x997   :  { %1084 = vmatpush.msra.mxu1 %v1654_v20 }
 0x998   :  { %v1024_v60 = vpop.f32.mrf.mxu3 }
 0x999   :  { %1085 = vmatpush.msra.mxu1 %v1653_v23  ;;  %v1025_v61 = vadd.f32 %v1721_v4, %v1024_v60 }
 0x99a   :  { %1661 = vmatpush.xpose.msk.msra.mxu2 %vm246_vm8, %v1055_v26  ;;  %1634 = vmatmul.msk.f32.gmra.mxu1 %vm246_vm8, %v837_v25  ;;  %v1666_v25 = vld [vmem:[%s2550_s10 + $0x30] sm:$0xff] }
 0x99b   :  { %1231 = vmatpush.msrb.mxu1 %v1638_v51 }
 0x99d   :  { %1232 = vmatpush.msrb.mxu1 %v1637_v62 }
 0x9a2   :  { %1658 = vmatmul.msk.f32.vlgmr.msra.gmra.mxu1 %vm83_vm0, %v2277_v58 }
 0x9aa   :  { %1659 = vmatmul.msk.f32.gmra.mxu1 %vm83_vm0, %v2286_v0 }
 0xa0f   :  { %v934_v27 = vpop.f32.mrf.mxu1 }
 0xa10   :  { %v935_v28 = vadd.f32 %v934_v27, %v2082_v30 }
 0xa12   :  { %v940_v29 = vsel %vm246_vm8, %v935_v28, -inf }
 0xa13   :  { %941 = vmax.xlane.f32.xlu2 %v940_v29  ;;  %v1723_v29 = vld [vmem:[%s2551_s11 + $0x1] ss:$0 sm:$0xff] }
 0xa17   :  { %v937_v31 = vpop.f32.mrf.mxu1 }
 0xa18   :  { %v938_v32 = vadd.f32 %v937_v31, %v2089_v34 }
 0xa1a   :  { %v943_v33 = vsel %vm246_vm8, %v938_v32, -inf }
 0xa1b   :  { %944 = vmax.xlane.f32.xlu0 %v943_v33 }
 0xa1f   :  { %v1087_v35 = vpop.f32.mrf.mxu1 }
 0xa20   :  { %v1088_v39 = vadd.f32 %v1722_v36, %v1087_v35 }
 0xa27   :  { %v1090_v37 = vpop.f32.mrf.mxu1 }
 0xa28   :  { %v1091_v38 = vadd.f32 %v1722_v36, %v1090_v37 }
 0xa2a   :  { %1170 = vmatpush.msra.mxu3 %v1091_v38 }
 0xa2c   :  { %1171 = vmatpush.msra.mxu3 %v1088_v39 }
 0xa86   :  { %v942_v40 = vpop.xlane.xlu2 %941 }
 0xa87   :  { %v946_v41 = vsub.f32 %v935_v28, %v942_v40 }
 0xa89   :  { %v948_v42 = vmul.f32 1.442695, %v946_v41 }
 0xa8b   :  { %1766 = vpow2.f32 %v948_v42 }
 0xa8e   :  { %v945_v43 = vpop.xlane.xlu0 %944 }
 0xa8f   :  { %v947_v44 = vsub.f32 %v938_v32, %v945_v43 }
 0xa91   :  { %v1767_v45 = vpop.eup %1766  ;;  %v950_v46 = vmul.f32 1.442695, %v947_v44 }
 0xa92   :  { %v952_v47 = vsel %vm246_vm8, %v1767_v45, 0.0 }
 0xa93   :  { %1768 = vpow2.f32 %v950_v46  ;;  %953 = vadd.xlane.f32.xlu1 %v952_v47 }
 0xa99   :  { %v1769_v48 = vpop.eup %1768 }
 0xa9a   :  { %v955_v49 = vsel %vm246_vm8, %v1769_v48, 0.0 }
 0xa9b   :  { %956 = vadd.xlane.f32.xlu2 %v955_v49 }
 0xb06   :  { %v954_v50 = vpop.xlane.xlu1 %953 }
 0xb07   :  { %1770 = vrcp.f32 %v954_v50 }
 0xb0d   :  { %v1771_v52 = vpop.eup %1770 }
 0xb0e   :  { %v960_v59 = vmul.f32 %v1771_v52, %v1767_v45  ;;  %v957_v53 = vpop.xlane.xlu2 %956  ;;  %v1677_v52 = vld [vmem:[%s2555_s14 + $0x30] sm:$0xff] }
 0xb0f   :  { %1772 = vrcp.f32 %v957_v53  ;;  %v1675_v53 = vld [vmem:[%s2555_s14 + $0x20] sm:$0xff] }
 0xb10   :  { %1635 = vmatmul.msk.f32.vlgmr.msrb.gmra.mxu2 %vm246_vm8, %v960_v59  ;;  %v1676_v59 = vld [vmem:[%s2555_s14 + $0x28] sm:$0xff] }
 0xb15   :  { %v1773_v54 = vpop.eup %1772 }
 0xb16   :  { %v961_v55 = vmul.f32 %v1773_v54, %v1769_v48 }
 0xb18   :  { %1636 = vmatmul.msk.f32.gmra.mxu2 %vm246_vm8, %v961_v55 }
 0xb20   :  { %1662 = vmatmul.msk.f32.vlgmr.msra.gmra.mxu2 %vm246_vm8, %v1022_v57 }
 0xb28   :  { %1663 = vmatmul.msk.f32.gmra.mxu2 %vm246_vm8, %v1025_v61 }
 0xb93   :  { %v985_v63 = vpop.f32.mrf.mxu2 }
 0xb94   :  { %1670 = vmatmul.msk.f32.vlgmr.msrb.gmra.mxu1 %vm246_vm8, %v985_v63 }
 0xb9b   :  { %v988_v1 = vpop.f32.mrf.mxu2 }
 0xb9c   :  { %1671 = vmatmul.msk.f32.gmra.mxu1 %vm246_vm8, %v988_v1 }
 0xba3   :  { %v1122_v2 = vpop.f32.mrf.mxu2 }
 0xba4   :  { %v1123_v3 = vadd.f32 %v1122_v2, %v2082_v30 }
 0xba6   :  { %v1128_v5 = vsel %vm246_vm8, %v1123_v3, -inf }
 0xba7   :  { %1129 = vmax.xlane.f32.xlu0 %v1128_v5 }
 0xbab   :  { %v1125_v6 = vpop.f32.mrf.mxu2 }
 0xbac   :  { %v1126_v7 = vadd.f32 %v1125_v6, %v2089_v34  ;;  %v1667_v34 = vld [vmem:[%s2550_s10 + $0x38] sm:$0xff] }
 0xbad   :  { %1202 = vmatpush.msra.mxu0 %v1667_v34 }
 0xbae   :  { %v1131_v8 = vsel %vm246_vm8, %v1126_v7, -inf }
 0xbaf   :  { %1132 = vmax.xlane.f32.xlu1 %v1131_v8  ;;  %1203 = vmatpush.msra.mxu0 %v1666_v25  ;;  %v1684_v25 = vld [vmem:[%s2557_s16 + $0x50] sm:$0xff] }
 0xc11   :  { %v1234_v28 = vpop.f32.mrf.mxu1 }
 0xc19   :  { %v1237_v37 = vpop.f32.mrf.mxu1 }
 0xc1a   :  { %v1130_v9 = vpop.xlane.xlu0 %1129 }
 0xc1b   :  { %v1134_v11 = vsub.f32 %v1123_v3, %v1130_v9 }
 0xc1d   :  { %v1136_v12 = vmul.f32 1.442695, %v1134_v11 }
 0xc1f   :  { %1774 = vpow2.f32 %v1136_v12  ;;  %v1725_v12 = vld [vmem:[%s2553_s13 + $0x1] ss:$0 sm:$0xff] }
 0xc22   :  { %v1133_v13 = vpop.xlane.xlu1 %1132 }
 0xc23   :  { %v1135_v14 = vsub.f32 %v1126_v7, %v1133_v13  ;;  %v1724_v7 = vld [vmem:[%s2552_s12 + $0x1] ss:$0 sm:$0xff] }
 0xc25   :  { %v1775_v15 = vpop.eup %1774  ;;  %v1138_v16 = vmul.f32 1.442695, %v1135_v14 }
 0xc26   :  { %v1140_v17 = vsel %vm246_vm8, %v1775_v15, 0.0 }
 0xc27   :  { %1776 = vpow2.f32 %v1138_v16  ;;  %1141 = vadd.xlane.f32.xlu2 %v1140_v17 }
 0xc2d   :  { %v1777_v30 = vpop.eup %1776 }
 0xc2e   :  { %v1143_v18 = vsel %vm246_vm8, %v1777_v30, 0.0 }
 0xc2f   :  { %1144 = vadd.xlane.f32.xlu0 %v1143_v18 }
 0xc9a   :  { %v1142_v19 = vpop.xlane.xlu2 %1141 }
 0xc9b   :  { %1778 = vrcp.f32 %v1142_v19 }
 0xca1   :  { %v1779_v20 = vpop.eup %1778 }
 0xca2   :  { %v1148_v21 = vmul.f32 %v1779_v20, %v1775_v15  ;;  %v1145_v22 = vpop.xlane.xlu0 %1144  ;;  %v1689_v20 = vld [vmem:[%s2557_s16 + $0x78] sm:$0xff] }
 0xca3   :  { %1780 = vrcp.f32 %v1145_v22  ;;  %1392 = vmatpush.msrb.mxu3 %v1689_v20  ;;  %v1687_v22 = vld [vmem:[%s2557_s16 + $0x68] sm:$0xff] }
 0xca4   :  { %1664 = vmatmul.msk.f32.vlgmr.msra.gmra.mxu3 %vm246_vm8, %v1148_v21  ;;  %v1688_v21 = vld [vmem:[%s2557_s16 + $0x70] sm:$0xff] }
 0xca5   :  { %1393 = vmatpush.msrb.mxu3 %v1688_v21 }
 0xca7   :  { %1394 = vmatpush.msrb.mxu3 %v1687_v22  ;;  %v1519_v22 = vld [vmem:[%s2562_s22 + $0x58] sm:$0xff] }
 0xca9   :  { %v1781_v23 = vpop.eup %1780 }
 0xcaa   :  { %v1149_v24 = vmul.f32 %v1781_v23, %v1777_v30  ;;  %v1686_v23 = vld [vmem:[%s2557_s16 + $0x60] sm:$0xff] }
 0xcab   :  { %1395 = vmatpush.msrb.mxu3 %v1686_v23 }
 0xcac   :  { %1665 = vmatmul.msk.f32.gmra.mxu3 %vm246_vm8, %v1149_v24  ;;  %v1685_v24 = vld [vmem:[%s2557_s16 + $0x58] sm:$0xff] }
 0xcad   :  { %1396 = vmatpush.msrb.mxu3 %v1685_v24  ;;  %v1518_v24 = vld [vmem:[%s2562_s22 + $0x50] sm:$0xff] }
 0xcaf   :  { %1397 = vmatpush.msrb.mxu3 %v1684_v25 }
 0xd27   :  { %v1173_v26 = vpop.f32.mrf.mxu3 }
 0xd28   :  { %1668 = vmatmul.msk.f32.vlgmr.msra.gmra.mxu0 %vm246_vm8, %v1173_v26  ;;  %v1683_v26 = vld [vmem:[%s2557_s16 + $0x48] sm:$0xff] }
 0xd29   :  { %1398 = vmatpush.msrb.mxu3 %v1683_v26 }
 0xd2f   :  { %v1176_v27 = vpop.f32.mrf.mxu3 }
 0xd30   :  { %1669 = vmatmul.msk.f32.gmra.mxu0 %vm246_vm8, %v1176_v27  ;;  %v1682_v27 = vld [vmem:[%s2557_s16 + $0x40] sm:$0xff] }
 0xd31   :  { %1399 = vmatpush.msrb.mxu3 %v1682_v27  ;;  %v1516_v27 = vld [vmem:[%s2562_s22 + $0x40] sm:$0xff] }
 0xda5   :  { %v1205_v31 = vpop.f32.mrf.mxu0 }
 0xda6   :  { %v1235_v32 = vadd.f32 %v1234_v28, %v1205_v31  ;;  %v1726_v28 = vld [vmem:[%s2554_s15 + $0x1] ss:$0 sm:$0xff] }
 0xda8   :  { %v1245_v33 = vadd.f32 %v1723_v29, %v1235_v32 }
 0xdaa   :  { %v1247_v35 = vadd.f32 %v1245_v33, %v2277_v58 }
 0xdac   :  { %v1253_v36 = vsel %vm83_vm0, %v1247_v35, 0.0 }
 0xdad   :  { %1254 = vadd.xlane.f32.xlu1 %v1253_v36  ;;  %v1208_v38 = vpop.f32.mrf.mxu0 }
 0xdae   :  { %v1238_v39 = vadd.f32 %v1237_v37, %v1208_v38 }
 0xdb0   :  { %v1246_v40 = vadd.f32 %v1723_v29, %v1238_v39 }
 0xdb2   :  { %v1248_v41 = vadd.f32 %v1246_v40, %v2286_v0  ;;  %v1678_v0 = vld [vmem:[%s2555_s14 + $0x38] sm:$0xff] }
 0xdb3   :  { %1335 = vmatpush.msrb.mxu2 %v1678_v0  ;;  %v1727_v0 = vld [vmem:[%s2556_s17 + $0x1] ss:$0 sm:$0xff]  ;;  %s2596_s17 = sld [smem:[#allocation12_spill]] }
 0xdb4   :  { %v1256_v42 = vsel %vm83_vm0, %v1248_v41, 0.0 }
 0xdb5   :  { %1257 = vadd.xlane.f32.xlu2 %v1256_v42  ;;  %1336 = vmatpush.msrb.mxu2 %v1677_v52 }
 0xdb7   :  { %1337 = vmatpush.msrb.mxu2 %v1676_v59 }
 0xdb9   :  { %1338 = vmatpush.msrb.mxu2 %v1675_v53 }
 0xe20   :  { %v1255_v43 = vpop.xlane.xlu1 %1254 }
 0xe21   :  { %v1259_v44 = vmul.f32 %v1255_v43, %v1937_v10 }
 0xe23   :  { %v1261_v45 = vsub.f32 %v1247_v35, %v1259_v44 }
 0xe25   :  { %v1263_v46 = vmul.f32 %v1261_v45, %v1261_v45 }
 0xe27   :  { %v1265_v47 = vsel %vm83_vm0, %v1263_v46, 0.0 }
 0xe28   :  { %1266 = vadd.xlane.f32.xlu0 %v1265_v47  ;;  %v1258_v58 = vpop.xlane.xlu2 %1257 }
 0xe29   :  { %v1260_v48 = vmul.f32 %v1258_v58, %v1937_v10 }
 0xe2b   :  { %v1262_v49 = vsub.f32 %v1248_v41, %v1260_v48 }
 0xe2d   :  { %v1264_v50 = vmul.f32 %v1262_v49, %v1262_v49 }
 0xe2f   :  { %v1268_v51 = vsel %vm83_vm0, %v1264_v50, 0.0 }
 0xe30   :  { %1269 = vadd.xlane.f32.xlu1 %v1268_v51 }
 0xe9b   :  { %v1267_v54 = vpop.xlane.xlu0 %1266 }
 0xe9c   :  { %v1271_v55 = vmul.f32 %v1267_v54, %v1937_v10 }
 0xe9e   :  { %v1273_v56 = vadd.f32 1e-12, %v1271_v55 }
 0xea0   :  { %1782 = vrsqrt.f32 %v1273_v56  ;;  %vm1281_vm8 = vweird.f32 %v1273_v56 }
 0xea3   :  { %v1270_v4 = vpop.xlane.xlu1 %1269 }
 0xea4   :  { %v1272_v57 = vmul.f32 %v1270_v4, %v1937_v10 }
 0xea6   :  { %v1783_v60 = vpop.eup %1782  ;;  %v1274_v61 = vadd.f32 1e-12, %v1272_v57 }
 0xea7   :  { %v1276_v62 = vmul.f32 %v1783_v60, %v1273_v56  ;;  %vm1282_vm7 = vweird.f32 %v1783_v60 }
 0xea8   :  { %1784 = vrsqrt.f32 %v1274_v61  ;;  %vm1283_vm9 = vmor %vm1281_vm8, %vm1282_vm7  ;;  %vm1291_vm11 = vweird.f32 %v1274_v61 }
 0xea9   :  { %v1277_v63 = vmul.f32 %v1783_v60, %v1276_v62 }
 0xeab   :  { %v1278_v1 = vmul.f32 0.5, %v1277_v63 }
 0xead   :  { %v1279_v2 = vsub.f32 1.5, %v1278_v1 }
 0xeae   :  { %v1785_v3 = vpop.eup %1784 }
 0xeaf   :  { %v1280_v5 = vmul.f32 %v1783_v60, %v1279_v2  ;;  %v1286_v6 = vmul.f32 %v1785_v3, %v1274_v61  ;;  %vm1292_vm10 = vweird.f32 %v1785_v3 }
 0xeb0   :  { %vm1293_vm12 = vmor %vm1291_vm11, %vm1292_vm10 }
 0xeb1   :  { %v1284_v8 = vsel %vm1283_vm9, %v1783_v60, %v1280_v5  ;;  %v1287_v9 = vmul.f32 %v1785_v3, %v1286_v6 }
 0xeb2   :  { %v1295_v11 = vmul.f32 %v1284_v8, %v1261_v45  ;;  %v1470_v8 = vld [vmem:[%s2561_s20 + $0x18] sm:$0xff] }
 0xeb3   :  { %v1288_v13 = vmul.f32 0.5, %v1287_v9  ;;  %1493 = vmatpush.msrb.mxu0 %v1470_v8  ;;  %v1469_v9 = vld [vmem:[%s2561_s20 + $0x10] sm:$0xff] }
 0xeb4   :  { %v1300_v14 = vmul.f32 %v1724_v7, %v1295_v11  ;;  %v1468_v11 = vld [vmem:[%s2561_s20 + $0x8] sm:$0xff] }
 0xeb5   :  { %v1289_v15 = vsub.f32 1.5, %v1288_v13  ;;  %1494 = vmatpush.msrb.mxu0 %v1469_v9 }
 0xeb6   :  { %v1305_v16 = vadd.f32 %v1725_v12, %v1300_v14 }
 0xeb7   :  { %v1290_v17 = vmul.f32 %v1785_v3, %v1289_v15  ;;  %1495 = vmatpush.msrb.mxu0 %v1468_v11 }
 0xeb8   :  { %1680 = vmatmul.msk.f32.vlgmr.msrb.gmra.mxu2 %vm83_vm0, %v1305_v16 }
 0xeb9   :  { %v1294_v30 = vsel %vm1293_vm12, %v1785_v3, %v1290_v17  ;;  %v1522_v17 = vld [vmem:[%s2562_s22 + $0x70] sm:$0xff] }
 0xeba   :  { %v1296_v18 = vmul.f32 %v1294_v30, %v1262_v49  ;;  %v1521_v30 = vld [vmem:[%s2562_s22 + $0x68] sm:$0xff] }
 0xebc   :  { %v1301_v34 = vmul.f32 %v1724_v7, %v1296_v18 }
 0xebe   :  { %v1306_v19 = vadd.f32 %v1725_v12, %v1301_v34  ;;  %v1467_v12 = vld [vmem:[%s2561_s20] sm:$0xff] }
 0xebf   :  { %1496 = vmatpush.msrb.mxu0 %v1467_v12 }
 0xec0   :  { %1681 = vmatmul.msk.f32.gmra.mxu2 %vm83_vm0, %v1306_v19 }
 0xf3b   :  { %v1340_v29 = vpop.f32.mrf.mxu2 }
 0xf3c   :  { %v1341_v31 = vadd.f32 %v1726_v28, %v1340_v29 }
 0xf3e   :  { %v1348_v32 = vmul.f32 0.044715, %v1341_v31  ;;  %v1346_v46 = vmul.f32 0.5, %v1341_v31 }
 0xf40   :  { %v1350_v33 = vmul.f32 %v1348_v32, %v1341_v31 }
 0xf42   :  { %v1352_v35 = vmul.f32 %v1350_v33, %v1341_v31 }
 0xf43   :  { %v1343_v36 = vpop.f32.mrf.mxu2 }
 0xf44   :  { %v1354_v37 = vadd.f32 %v1352_v35, %v1341_v31  ;;  %v1344_v38 = vadd.f32 %v1726_v28, %v1343_v36  ;;  %v1515_v31 = vld [vmem:[%s2562_s22 + $0x38] sm:$0xff]  ;;  %v1728_v35 = vld [vmem:[%s2558_s18 + $0x1] ss:$0 sm:$0xff]  ;;  %v1514_v36 = vld [vmem:[%s2562_s22 + $0x30] sm:$0xff] }
 0xf46   :  { %v1356_v39 = vmul.f32 0.7978846, %v1354_v37  ;;  %v1349_v40 = vmul.f32 0.044715, %v1344_v38  ;;  %v1347_v49 = vmul.f32 0.5, %v1344_v38 }
 0xf48   :  { %1786 = vtanh.f32 %v1356_v39  ;;  %v1351_v41 = vmul.f32 %v1349_v40, %v1344_v38  ;;  %v1729_v40 = vld [vmem:[%s2559_s19 + $0x1] ss:$0 sm:$0xff] }
 0xf4a   :  { %v1353_v42 = vmul.f32 %v1351_v41, %v1344_v38  ;;  %v1513_v41 = vld [vmem:[%s2562_s22 + $0x28] sm:$0xff] }
 0xf4c   :  { %v1355_v43 = vadd.f32 %v1353_v42, %v1344_v38 }
 0xf4e   :  { %v1787_v44 = vpop.eup %1786  ;;  %v1357_v45 = vmul.f32 0.7978846, %v1355_v43 }
 0xf4f   :  { %v1360_v47 = vadd.f32 1.0, %v1787_v44 }
 0xf50   :  { %1788 = vtanh.f32 %v1357_v45 }
 0xf51   :  { %v1362_v58 = vmul.f32 %v1360_v47, %v1346_v46 }
 0xf53   :  { %1691 = vmatmul.msk.f32.vlgmr.msrb.gmra.mxu3 %vm712_vm15, %v1362_v58 }
 0xf56   :  { %v1789_v48 = vpop.eup %1788 }
 0xf57   :  { %v1361_v50 = vadd.f32 1.0, %v1789_v48 }
 0xf59   :  { %v1363_v51 = vmul.f32 %v1361_v50, %v1347_v49  ;;  %v1512_v50 = vld [vmem:[%s2562_s22 + $0x20] sm:$0xff] }
 0xf5b   :  { %1692 = vmatmul.msk.f32.gmra.mxu3 %vm712_vm15, %v1363_v51  ;;  %v1511_v51 = vld [vmem:[%s2562_s22 + $0x18] sm:$0xff] }
 0xfd6   :  { %v1401_v52 = vpop.f32.mrf.mxu3 }
 0xfd7   :  { %v1402_v59 = vadd.f32 %v1727_v0, %v1401_v52  ;;  %v1509_v52 = vld [vmem:[%s2562_s22 + $0x8] sm:$0xff] }
 0xfd9   :  { %v1407_v53 = vadd.f32 %v1402_v59, %v1305_v16  ;;  %v1523_v16 = vld [vmem:[%s2562_s22 + $0x78] sm:$0xff]  ;;  %v1508_v59 = vld [vmem:[%s2562_s22] sm:$0xff] }
 0xfda   :  { %1528 = vmatpush.msra.mxu1 %v1523_v16 }
 0xfdb   :  { %v1413_v54 = vsel %vm83_vm0, %v1407_v53, 0.0 }
 0xfdc   :  { %1414 = vadd.xlane.f32.xlu2 %v1413_v54  ;;  %1529 = vmatpush.msra.mxu1 %v1522_v17 }
 0xfde   :  { %v1404_v55 = vpop.f32.mrf.mxu3  ;;  %1530 = vmatpush.msra.mxu1 %v1521_v30 }
 0xfdf   :  { %v1405_v56 = vadd.f32 %v1727_v0, %v1404_v55  ;;  %v1510_v0 = vld [vmem:[%s2562_s22 + $0x10] sm:$0xff] }
 0xfe1   :  { %v1408_v4 = vadd.f32 %v1405_v56, %v1306_v19  ;;  %v1520_v19 = vld [vmem:[%s2562_s22 + $0x60] sm:$0xff] }
 0xfe2   :  { %1531 = vmatpush.msra.mxu1 %v1520_v19 }
 0xfe3   :  { %v1416_v57 = vsel %vm83_vm0, %v1408_v4, 0.0 }
 0xfe4   :  { %1417 = vadd.xlane.f32.xlu0 %v1416_v57  ;;  %1532 = vmatpush.msra.mxu1 %v1519_v22 }
 0xfe6   :  { %1533 = vmatpush.msra.mxu1 %v1518_v24 }
0x104f   :  { %v1415_v60 = vpop.xlane.xlu2 %1414 }
0x1050   :  { %v1419_v61 = vmul.f32 %v1415_v60, %v1937_v10 }
0x1052   :  { %v1421_v62 = vsub.f32 %v1407_v53, %v1419_v61  ;;  %v1730_v53 = vld [vmem:[%s2560_s21] ss:$0 sm:$0xff] }
0x1053   :  { %v1731_v61 = vld [vmem:[%s2563_s23] ss:$0 sm:$0xff] }
0x1054   :  { %v1423_v63 = vmul.f32 %v1421_v62, %v1421_v62 }
0x1056   :  { %v1425_v1 = vsel %vm83_vm0, %v1423_v63, 0.0 }
0x1057   :  { %v1418_v2 = vpop.xlane.xlu0 %1417  ;;  %1426 = vadd.xlane.f32.xlu1 %v1425_v1 }
0x1058   :  { %v1420_v3 = vmul.f32 %v1418_v2, %v1937_v10 }
0x105a   :  { %v2446_v5 = vsub.f32 %v1408_v4, %v1420_v3 }
0x105c   :  { %v1424_v6 = vmul.f32 %v2446_v5, %v2446_v5 }
0x105e   :  { %v1428_v7 = vsel %vm83_vm0, %v1424_v6, 0.0 }
0x105f   :  { %1429 = vadd.xlane.f32.xlu2 %v1428_v7 }
0x10ca   :  { %v1427_v13 = vpop.xlane.xlu1 %1426 }
0x10cb   :  { %v1431_v14 = vmul.f32 %v1427_v13, %v1937_v10 }
0x10cd   :  { %v1433_v15 = vadd.f32 1e-12, %v1431_v14 }
0x10cf   :  { %1790 = vrsqrt.f32 %v1433_v15  ;;  %vm1441_vm14 = vweird.f32 %v1433_v15 }
0x10d2   :  { %v1430_v18 = vpop.xlane.xlu2 %1429 }
0x10d3   :  { %v1432_v34 = vmul.f32 %v1430_v18, %v1937_v10  ;;  %v1517_v10 = vld [vmem:[%s2562_s22 + $0x48] sm:$0xff] }
0x10d4   :  { %1534 = vmatpush.msra.mxu1 %v1517_v10 }
0x10d5   :  { %v1791_v20 = vpop.eup %1790  ;;  %v1434_v21 = vadd.f32 1e-12, %v1432_v34 }
0x10d6   :  { %v1436_v23 = vmul.f32 %v1791_v20, %v1433_v15  ;;  %vm1442_vm13 = vweird.f32 %v1791_v20  ;;  %1535 = vmatpush.msra.mxu1 %v1516_v27 }
0x10d7   :  { %1792 = vrsqrt.f32 %v1434_v21  ;;  %vm1443_vm15 = vmor %vm1441_vm14, %vm1442_vm13  ;;  %vm1451_vm2 = vweird.f32 %v1434_v21 }
0x10d8   :  { %v1437_v25 = vmul.f32 %v1791_v20, %v1436_v23  ;;  %1536 = vmatpush.msra.mxu1 %v1515_v31 }
0x10da   :  { %v1438_v26 = vmul.f32 0.5, %v1437_v25  ;;  %1537 = vmatpush.msra.mxu1 %v1514_v36 }
0x10dc   :  { %v1439_v28 = vsub.f32 1.5, %v1438_v26  ;;  %1538 = vmatpush.msra.mxu1 %v1513_v41 }
0x10dd   :  { %v1793_v29 = vpop.eup %1792 }
0x10de   :  { %v1440_v32 = vmul.f32 %v1791_v20, %v1439_v28  ;;  %v1446_v33 = vmul.f32 %v1793_v29, %v1434_v21  ;;  %vm1452_vm1 = vweird.f32 %v1793_v29  ;;  %1539 = vmatpush.msra.mxu1 %v1512_v50 }
0x10df   :  { %vm1453_vm3 = vmor %vm1451_vm2, %vm1452_vm1 }
0x10e0   :  { %v1444_v37 = vsel %vm1443_vm15, %v1791_v20, %v1440_v32  ;;  %v1447_v38 = vmul.f32 %v1793_v29, %v1446_v33  ;;  %1540 = vmatpush.msra.mxu1 %v1511_v51 }
0x10e1   :  { %v1455_v39 = vmul.f32 %v1444_v37, %v1421_v62 }
0x10e2   :  { %v1448_v42 = vmul.f32 0.5, %v1447_v38  ;;  %1541 = vmatpush.msra.mxu1 %v1510_v0 }
0x10e3   :  { %v1460_v43 = vmul.f32 %v1728_v35, %v1455_v39 }
0x10e4   :  { %v1449_v44 = vsub.f32 1.5, %v1448_v42  ;;  %1542 = vmatpush.msra.mxu1 %v1509_v52 }
0x10e5   :  { %v1465_v45 = vadd.f32 %v1729_v40, %v1460_v43 }
0x10e6   :  { %v1450_v46 = vmul.f32 %v1793_v29, %v1449_v44  ;;  %1543 = vmatpush.msra.mxu1 %v1508_v59 }
0x10e7   :  { %1695 = vmatmul.msk.f32.vlgmr.msrb.gmra.mxu0 %vm83_vm0, %v1465_v45 }
0x10e8   :  { %v1454_v47 = vsel %vm1453_vm3, %v1793_v29, %v1450_v46 }
0x10e9   :  { %v1456_v58 = vmul.f32 %v1454_v47, %v2446_v5 }
0x10eb   :  { %v1461_v48 = vmul.f32 %v1728_v35, %v1456_v58 }
0x10ed   :  { %v1466_v49 = vadd.f32 %v1729_v40, %v1461_v48 }
0x10ef   :  { %1696 = vmatmul.msk.f32.gmra.mxu0 %vm83_vm0, %v1466_v49 }
0x1164   :  { %v1498_v54 = vpop.f32.mrf.mxu0 }
0x1165   :  { %v1499_v55 = vadd.f32 %v1730_v53, %v1498_v54 }
0x1167   :  { %1794 = vtanh.f32 %v1499_v55 }
0x116c   :  { %v1501_v56 = vpop.f32.mrf.mxu0 }
0x116d   :  { %v1795_v4 = vpop.eup %1794  ;;  %v1502_v57 = vadd.f32 %v1730_v53, %v1501_v56 }
0x116e   :  { %1506 = vst [vmem:[%s2564_s25] sm:$0xff] %v1795_v4  ;;  %1544 = vmatmul.f32.vlgmr.msra.gmra.mxu1 %v1795_v4 }
0x116f   :  { %1796 = vtanh.f32 %v1502_v57 }
0x1175   :  { %v1797_v60 = vpop.eup %1796 }
0x1176   :  { %1507 = vst [vmem:[%s2564_s25 + $0x8] sm:$0xff] %v1797_v60  ;;  %1547 = vmatmul.f32.gmra.mxu1 %v1797_v60 }
0x11eb   :  { %v1545_v62 = vpop.f32.mrf.mxu1 }
0x11ec   :  { %v1546_v63 = vadd.f32 %v1731_v61, %v1545_v62 }
0x11ee   :  { %1551 = vst [vmem:[%s2596_s17] sm:$0xff] %v1546_v63 }
0x11f3   :  { %v1548_v1 = vpop.f32.mrf.mxu1 }
0x11f4   :  { %v1549_v2 = vadd.f32 %v1731_v61, %v1548_v1 }
0x11f6   :  { %1552 = vst [vmem:[%s2596_s17 + $0x8] sm:$0xff] %v1549_v2 }

</bundles_post_ra>
